<compile_context>
chip_gen: v6e
topology: v6e:2x2x1
jax: 0.10.0
libtpu: 0.0.40
codegen_flags: <defaults>
</compile_context>

<pallas_src>
import functools

import jax
import jax.numpy as jnp
from jax.experimental import pallas as pl
from jax.experimental.pallas import tpu as pltpu

LN_EPS = 1e-12        # config.layer_norm_eps (HF ViTConfig default)
TIME_LN_EPS = 1e-5    # nn.LayerNorm default eps inside ViTTimeEmbedding
INV_SQRT2 = 0.7071067811865476


def _layernorm(x, gamma, beta, eps):
    mu = jnp.mean(x, axis=-1, keepdims=True)
    xc = x - mu
    var = jnp.mean(xc * xc, axis=-1, keepdims=True)
    return xc * jax.lax.rsqrt(var + eps) * gamma + beta


def _gelu_exact(x):
    # exact (erf-based) GELU, matching HF ACT2FN["gelu"]
    return 0.5 * x * (1.0 + jax.lax.erf(x * INV_SQRT2))


def vit_encoder_kernel(lmap_ref, x_ref, t_ref,
                       g1_ref, b1_ref, g2_ref, b2_ref,
                       wq_ref, bq_ref, wk_ref, bk_ref, wv_ref, bv_ref,
                       wo_ref, bo_ref, wi_ref, bi_ref, w2_ref, b2o_ref,
                       o_ref, h_scr,
                       *, num_heads, head_dim, batch_tile, seq_len):
    del lmap_ref   # only used by the BlockSpec index_maps (scalar prefetch)
    H = num_heads * head_dim
    M = batch_tile * seq_len
    step = pl.program_id(1)

    # First step of this batch tile: load the hidden state into the VMEM carry.
    # Subsequent steps read the carry -> no HBM round-trip between layers.
    @pl.when(step == 0)
    def _():
        h_scr[...] = x_ref[...].reshape(M, H).astype(jnp.float32)

    x = h_scr[...]                                   # (M, H) f32 carried hidden state
    t = t_ref[0].astype(jnp.float32)                 # (1, H) time embedding (zeros for in/out steps)

    y = x + t                                        # y = hidden_states + time_e
    yn = _layernorm(y, g1_ref[...], b1_ref[...], LN_EPS)        # layernorm_before (f32)

    # --- attention: full-width bf16 QKV projections, f32 accumulation ---
    yb = yn.astype(jnp.bfloat16)
    q = jnp.dot(yb, wq_ref[...], preferred_element_type=jnp.float32) + bq_ref[...]
    k = jnp.dot(yb, wk_ref[...], preferred_element_type=jnp.float32) + bk_ref[...]
    v = jnp.dot(yb, wv_ref[...], preferred_element_type=jnp.float32) + bv_ref[...]
    q = q * (1.0 / (head_dim ** 0.5))                # fold scale into q once

    q3 = q.reshape(batch_tile, seq_len, H).astype(jnp.bfloat16)
    k3 = k.reshape(batch_tile, seq_len, H).astype(jnp.bfloat16)
    v3 = v.reshape(batch_tile, seq_len, H).astype(jnp.bfloat16)

    # Per-head score/softmax/context (scores are inherently per-head); contexts
    # are concatenated and projected by Wo with a single full-width matmul.
    ctx_heads = []
    for h in range(num_heads):
        sl = slice(h * head_dim, (h + 1) * head_dim)
        s = jnp.einsum('bqd,bkd->bqk', q3[:, :, sl], k3[:, :, sl],
                       preferred_element_type=jnp.float32)              # (Bt, S, S) f32
        s = s - jnp.max(s, axis=-1, keepdims=True)
        p = jnp.exp(s)
        p = p * pl.reciprocal(jnp.sum(p, axis=-1, keepdims=True), approx=True)
        ctx_heads.append(jnp.einsum('bqk,bkd->bqd', p.astype(jnp.bfloat16),
                                    v3[:, :, sl],
                                    preferred_element_type=jnp.float32))
    ctx = jnp.concatenate(ctx_heads, axis=-1).reshape(M, H)              # (M, H) f32

    attn = jnp.dot(ctx.astype(jnp.bfloat16), wo_ref[...],
                   preferred_element_type=jnp.float32) + bo_ref[...]

    # Residual carries the ORIGINAL hidden state (not y):
    # `hidden_states = attention_output + hidden_states` in ViTMiddleLayer.
    h1 = attn + x
    hn = _layernorm(h1, g2_ref[...], b2_ref[...], LN_EPS)                # layernorm_after
    inter = _gelu_exact(
        jnp.dot(hn.astype(jnp.bfloat16), wi_ref[...],
                preferred_element_type=jnp.float32) + bi_ref[...])
    out = jnp.dot(inter.astype(jnp.bfloat16), w2_ref[...],
                  preferred_element_type=jnp.float32) + b2o_ref[...] + h1

    h_scr[...] = out                                                     # carry for next step

    # Only materialize the output tile on the final step (single writeback per tile).
    @pl.when(step == pl.num_programs(1) - 1)
    def _():
        o_ref[...] = out.reshape(batch_tile, seq_len, H).astype(o_ref.dtype)


def time_table(tp, max_steps, H):
    """ViTTimeEmbedding for layer_time = 0..max_steps-1: embedding -> linear -> LN.
    Constant across batch/sequence -> a (max_steps, 1, H) table."""
    e = tp["emb"][:max_steps]                        # (T, H)
    v = e @ tp["w"] + tp["b"]
    mu = jnp.mean(v, axis=-1, keepdims=True)
    var = jnp.mean((v - mu) ** 2, axis=-1, keepdims=True)
    v = (v - mu) * jax.lax.rsqrt(var + TIME_LN_EPS) * tp["g"] + tp["beta"]
    return v.reshape(max_steps, 1, H)


def vit_encoder(x, params, *, max_steps, num_heads, batch_tile=1,
                vmem_limit_bytes=None):
    """input layer -> max_steps middle layers (shared weights, per-step time
    embedding) -> output layer, all inside one pallas_call."""
    B, S, H = x.shape
    I = params["input"]["wi"].shape[1]
    head_dim = H // num_heads
    assert B % batch_tile == 0
    T = max_steps + 2                                # total layer steps

    # step -> parameter block index (0=input, 1=middle, 2=output); scalar-prefetched.
    lmap = jnp.concatenate([
        jnp.zeros((1,), jnp.int32),
        jnp.ones((max_steps,), jnp.int32),
        jnp.full((1,), 2, jnp.int32),
    ]).astype(jnp.int32)

    # per-step additive time embedding (zeros for input/output steps)
    tt = jnp.zeros((T, 1, H), jnp.float32)
    if max_steps > 0:
        tt = tt.at[1:1 + max_steps].set(time_table(params["time"], max_steps, H))

    stack = lambda name: jnp.stack([params["input"][name],
                                    params["middle"][name],
                                    params["output"][name]], axis=0)

    def wspec(block_shape):
        # Stacked (3, ...) parameter: leading dim squeezed, block index chosen by the
        # scalar-prefetched layer map -> only re-DMA'd when the layer block changes.
        nd = len(block_shape)
        return pl.BlockSpec((None,) + block_shape,
                            lambda b, t, lm, _nd=nd: (lm[t],) + (0,) * _nd)

    kernel = functools.partial(vit_encoder_kernel, num_heads=num_heads,
                               head_dim=head_dim, batch_tile=batch_tile, seq_len=S)

    grid_spec = pltpu.PrefetchScalarGridSpec(
        num_scalar_prefetch=1,
        grid=(B // batch_tile, T),
        in_specs=[
            pl.BlockSpec((batch_tile, S, H), lambda b, t, lm: (b, 0, 0)),  # hidden states
            pl.BlockSpec((1, 1, H), lambda b, t, lm: (t, 0, 0)),           # per-step time embedding
            wspec((1, H)), wspec((1, H)), wspec((1, H)), wspec((1, H)),    # LN params
            wspec((H, H)), wspec((1, H)),                                  # Wq, bq
            wspec((H, H)), wspec((1, H)),                                  # Wk, bk
            wspec((H, H)), wspec((1, H)),                                  # Wv, bv
            wspec((H, H)), wspec((1, H)),                                  # Wo, bo   (ViTSelfOutput.dense)
            wspec((H, I)), wspec((1, I)),                                  # Wi, bi   (ViTIntermediate.dense)
            wspec((I, H)), wspec((1, H)),                                  # W2, b2   (ViTOutput.dense)
        ],
        out_specs=pl.BlockSpec((batch_tile, S, H), lambda b, t, lm: (b, 0, 0)),
        scratch_shapes=[pltpu.VMEM((batch_tile * S, H), jnp.float32)],
    )
    # TODO(synk): at ViT-Base scale raise vmem_limit_bytes (bf16 weights already
    # halve the footprint; needed on v7x 64 MiB VMEM) and consider Buffered(1) on
    # the weight specs.

    return pl.pallas_call(
        kernel,
        out_shape=jax.ShapeDtypeStruct((B, S, H), x.dtype),
        grid_spec=grid_spec,
        compiler_params=pltpu.CompilerParams(
            dimension_semantics=("parallel", "arbitrary"),
            vmem_limit_bytes=vmem_limit_bytes),
    )(lmap, x, tt,
      stack("g1"), stack("b1"), stack("g2"), stack("b2"),
      stack("wq"), stack("bq"), stack("wk"), stack("bk"), stack("wv"), stack("bv"),
      stack("wo"), stack("bo"), stack("wi"), stack("bi"), stack("w2"), stack("b2o"))


def init_block_params(key, H, I, wdtype=jnp.bfloat16):
    ks = jax.random.split(key, 6)
    s = 0.02
    w = lambda k, shape: (s * jax.random.normal(k, shape, dtype=jnp.float32)).astype(wdtype)
    z = lambda n: jnp.zeros((1, n), jnp.float32)
    return dict(
        g1=jnp.ones((1, H), jnp.float32), b1=z(H),
        g2=jnp.ones((1, H), jnp.float32), b2=z(H),
        wq=w(ks[0], (H, H)), bq=z(H),
        wk=w(ks[1], (H, H)), bk=z(H),
        wv=w(ks[2], (H, H)), bv=z(H),
        wo=w(ks[3], (H, H)), bo=z(H),
        wi=w(ks[4], (H, I)), bi=z(I),
        w2=w(ks[5], (I, H)), b2o=z(H),
    )


def init_time_params(key, H, n_emb):
    k1, k2 = jax.random.split(key)
    return dict(
        emb=0.02 * jax.random.normal(k1, (n_emb, H), dtype=jnp.float32),
        w=0.02 * jax.random.normal(k2, (H, H), dtype=jnp.float32),
        b=jnp.zeros((H,), jnp.float32),
        g=jnp.ones((H,), jnp.float32),
        beta=jnp.zeros((H,), jnp.float32),
    )


# ---------------- pure-JAX f32 reference (tolerance check) ----------------
def _block_ref(x, tvec, p, num_heads):
    B, S, H = x.shape
    hd = H // num_heads
    f = lambda a: jnp.asarray(a, jnp.float32)
    y = x + tvec
    yn = _layernorm(y, f(p["g1"]), f(p["b1"]), LN_EPS)
    q = yn @ f(p["wq"]) + f(p["bq"])
    k = yn @ f(p["wk"]) + f(p["bk"])
    v = yn @ f(p["wv"]) + f(p["bv"])
    split = lambda a: a.reshape(B, S, num_heads, hd).transpose(0, 2, 1, 3)
    qh, kh, vh = split(q), split(k), split(v)
    s = jnp.einsum('bhqd,bhkd->bhqk', qh, kh) / (hd ** 0.5)
    pr = jax.nn.softmax(s, axis=-1)
    ctx = jnp.einsum('bhqk,bhkd->bhqd', pr, vh).transpose(0, 2, 1, 3).reshape(B, S, H)
    attn = ctx @ f(p["wo"]) + f(p["bo"])
    h1 = attn + x
    hn = _layernorm(h1, f(p["g2"]), f(p["b2"]), LN_EPS)
    inter = _gelu_exact(hn @ f(p["wi"]) + f(p["bi"]))
    return inter @ f(p["w2"]) + f(p["b2o"]) + h1


def vit_encoder_ref(x, params, *, max_steps, num_heads):
    B, S, H = x.shape
    zeros = jnp.zeros((H,), jnp.float32)
    h = _block_ref(x, zeros, params["input"], num_heads)
    if max_steps > 0:
        tt = time_table(params["time"], max_steps, H).reshape(max_steps, H)
        for i in range(max_steps):
            h = _block_ref(h, tt[i], params["middle"], num_heads)
    h = _block_ref(h, zeros, params["output"], num_heads)
    return h


if __name__ == "__main__":
    # small synthetic ViTConfig: hidden_size=32, heads=4, intermediate=64,
    # num_hidden_layers=4 -> time-embedding table has 4-2=2 rows, so max_steps=2.
    B, S, H, I = 2, 8, 32, 64
    NUM_HEADS = 4
    NUM_HIDDEN_LAYERS = 4
    MAX_STEPS = 2

    key = jax.random.PRNGKey(0)
    kx, k_in, k_mid, k_out, k_time = jax.random.split(key, 5)

    x = jax.random.normal(kx, (B, S, H), dtype=jnp.float32)
    params = dict(
        input=init_block_params(k_in, H, I),
        middle=init_block_params(k_mid, H, I),
        output=init_block_params(k_out, H, I),
        time=init_time_params(k_time, H, NUM_HIDDEN_LAYERS - 2),
    )

    # batch_tile=1 keeps 2 independent "parallel" grid rows (v7x dual-TC friendly);
    # raise it for bigger batches to amortize per-step overhead / fill MXU M.
    out = vit_encoder(x, params, max_steps=MAX_STEPS, num_heads=NUM_HEADS, batch_tile=1)
    out = jax.block_until_ready(out)
    assert out.shape == (B, S, H)

    ref = vit_encoder_ref(x, params, max_steps=MAX_STEPS, num_heads=NUM_HEADS)
    err = float(jnp.max(jnp.abs(out - ref)))
    assert err < 5e-2, f"max abs err vs pure-JAX f32 reference: {err}"

    # TODO(synk): dropout layers are treated as identity (eval mode), matching
    # flash_attn_func's dropout_p=0.0 path when not training.
    print("KERNEL_OK")
</pallas_src>

<mosaic_0001>
module attributes {stable_mosaic.version = 11 : i64} {
  func.func @vit_encoder_kernel(%arg0: i32, %arg1: i32, %arg2: memref<4xi32, #tpu.memory_space<smem>>, %arg3: memref<1x8x32xf32, #tpu.memory_space<vmem>>, %arg4: memref<1x1x32xf32, #tpu.memory_space<vmem>>, %arg5: memref<1x1x32xf32, #tpu.memory_space<vmem>>, %arg6: memref<1x1x32xf32, #tpu.memory_space<vmem>>, %arg7: memref<1x1x32xf32, #tpu.memory_space<vmem>>, %arg8: memref<1x1x32xf32, #tpu.memory_space<vmem>>, %arg9: memref<1x32x32xbf16, #tpu.memory_space<vmem>>, %arg10: memref<1x1x32xf32, #tpu.memory_space<vmem>>, %arg11: memref<1x32x32xbf16, #tpu.memory_space<vmem>>, %arg12: memref<1x1x32xf32, #tpu.memory_space<vmem>>, %arg13: memref<1x32x32xbf16, #tpu.memory_space<vmem>>, %arg14: memref<1x1x32xf32, #tpu.memory_space<vmem>>, %arg15: memref<1x32x32xbf16, #tpu.memory_space<vmem>>, %arg16: memref<1x1x32xf32, #tpu.memory_space<vmem>>, %arg17: memref<1x32x64xbf16, #tpu.memory_space<vmem>>, %arg18: memref<1x1x64xf32, #tpu.memory_space<vmem>>, %arg19: memref<1x64x32xbf16, #tpu.memory_space<vmem>>, %arg20: memref<1x1x32xf32, #tpu.memory_space<vmem>>, %arg21: memref<1x8x32xf32, #tpu.memory_space<vmem>>, %arg22: memref<8x32xf32, #tpu.memory_space<vmem>>) attributes {dimension_semantics = [#tpu.dimension_semantics<parallel>, #tpu.dimension_semantics<arbitrary>], iteration_bounds = array<i64: 2, 4>, scalar_prefetch = 1 : i64, scratch_operands = 1 : i64, tpu.core_type = #tpu.core_type<tc>, window_params = [{transform_indices = @transform_0, window_bounds = array<i64: 1, 8, 32>}, {transform_indices = @transform_1, window_bounds = array<i64: 1, 1, 32>}, {transform_indices = @transform_2, window_bounds = array<i64: 1, 1, 32>}, {transform_indices = @transform_3, window_bounds = array<i64: 1, 1, 32>}, {transform_indices = @transform_4, window_bounds = array<i64: 1, 1, 32>}, {transform_indices = @transform_5, window_bounds = array<i64: 1, 1, 32>}, {transform_indices = @transform_6, window_bounds = array<i64: 1, 32, 32>}, {transform_indices = @transform_7, window_bounds = array<i64: 1, 1, 32>}, {transform_indices = @transform_8, window_bounds = array<i64: 1, 32, 32>}, {transform_indices = @transform_9, window_bounds = array<i64: 1, 1, 32>}, {transform_indices = @transform_10, window_bounds = array<i64: 1, 32, 32>}, {transform_indices = @transform_11, window_bounds = array<i64: 1, 1, 32>}, {transform_indices = @transform_12, window_bounds = array<i64: 1, 32, 32>}, {transform_indices = @transform_13, window_bounds = array<i64: 1, 1, 32>}, {transform_indices = @transform_14, window_bounds = array<i64: 1, 32, 64>}, {transform_indices = @transform_15, window_bounds = array<i64: 1, 1, 64>}, {transform_indices = @transform_16, window_bounds = array<i64: 1, 64, 32>}, {transform_indices = @transform_17, window_bounds = array<i64: 1, 1, 32>}, {transform_indices = @transform_18, window_bounds = array<i64: 1, 8, 32>}]} {
    %c0_i32 = arith.constant 0 : i32
    %0 = arith.cmpi eq, %arg1, %c0_i32 : i32
    %1 = arith.extui %0 : i1 to i32
    %c0_i32_0 = arith.constant 0 : i32
    %2 = arith.cmpi ne, %1, %c0_i32_0 : i32
    scf.if %2 {
      %c0_91 = arith.constant 0 : index
      %c0_92 = arith.constant 0 : index
      %c0_93 = arith.constant 0 : index
      %190 = vector.load %arg3[%c0_91, %c0_92, %c0_93] : memref<1x8x32xf32, #tpu.memory_space<vmem>>, vector<1x8x32xf32>
      %191 = vector.shape_cast %190 : vector<1x8x32xf32> to vector<8x32xf32>
      %c0_94 = arith.constant 0 : index
      %c0_95 = arith.constant 0 : index
      %192 = vector.load %arg22[%c0_94, %c0_95] : memref<8x32xf32, #tpu.memory_space<vmem>>, vector<8x32xf32>
      tpu.vector_store %arg22[%c0_94, %c0_95], %191 {strides = array<i32>} : memref<8x32xf32, #tpu.memory_space<vmem>>, vector<8x32xf32>,
    } else {
    }
    %c0 = arith.constant 0 : index
    %c0_1 = arith.constant 0 : index
    %3 = vector.load %arg22[%c0, %c0_1] : memref<8x32xf32, #tpu.memory_space<vmem>>, vector<8x32xf32>
    %c0_2 = arith.constant 0 : index
    %c0_3 = arith.constant 0 : index
    %c0_4 = arith.constant 0 : index
    %4 = vector.load %arg4[%c0_2, %c0_3, %c0_4] : memref<1x1x32xf32, #tpu.memory_space<vmem>>, vector<1x1x32xf32>
    %5 = vector.shape_cast %4 : vector<1x1x32xf32> to vector<1x32xf32>
    %6 = vector.broadcast %5 : vector<1x32xf32> to vector<8x32xf32>
    %7 = arith.addf %3, %6 : vector<8x32xf32>
    %c0_5 = arith.constant 0 : index
    %c0_6 = arith.constant 0 : index
    %c0_7 = arith.constant 0 : index
    %8 = vector.load %arg5[%c0_5, %c0_6, %c0_7] : memref<1x1x32xf32, #tpu.memory_space<vmem>>, vector<1x1x32xf32>
    %9 = vector.shape_cast %8 : vector<1x1x32xf32> to vector<1x32xf32>
    %c0_8 = arith.constant 0 : index
    %c0_9 = arith.constant 0 : index
    %c0_10 = arith.constant 0 : index
    %10 = vector.load %arg6[%c0_8, %c0_9, %c0_10] : memref<1x1x32xf32, #tpu.memory_space<vmem>>, vector<1x1x32xf32>
    %11 = vector.shape_cast %10 : vector<1x1x32xf32> to vector<1x32xf32>
    %cst = arith.constant dense<0.000000e+00> : vector<8xf32>
    %12 = vector.multi_reduction <add>, %7, %cst [1] : vector<8x32xf32> to vector<8xf32>
    %13 = vector.shape_cast %12 : vector<8xf32> to vector<8x1xf32>
    %cst_11 = arith.constant 3.200000e+01 : f32
    %14 = vector.broadcast %cst_11 : f32 to vector<8x1xf32>
    %15 = arith.divf %13, %14 : vector<8x1xf32>
    %16 = vector.broadcast %15 : vector<8x1xf32> to vector<8x32xf32>
    %17 = arith.subf %7, %16 : vector<8x32xf32>
    %18 = arith.mulf %17, %17 : vector<8x32xf32>
    %cst_12 = arith.constant dense<0.000000e+00> : vector<8xf32>
    %19 = vector.multi_reduction <add>, %18, %cst_12 [1] : vector<8x32xf32> to vector<8xf32>
    %20 = vector.shape_cast %19 : vector<8xf32> to vector<8x1xf32>
    %cst_13 = arith.constant 3.200000e+01 : f32
    %21 = vector.broadcast %cst_13 : f32 to vector<8x1xf32>
    %22 = arith.divf %20, %21 : vector<8x1xf32>
    %cst_14 = arith.constant 9.99999996E-13 : f32
    %23 = vector.broadcast %cst_14 : f32 to vector<8x1xf32>
    %24 = arith.addf %22, %23 : vector<8x1xf32>
    %25 = math.rsqrt %24 : vector<8x1xf32>
    %26 = vector.broadcast %25 : vector<8x1xf32> to vector<8x32xf32>
    %27 = arith.mulf %17, %26 : vector<8x32xf32>
    %28 = vector.broadcast %9 : vector<1x32xf32> to vector<8x32xf32>
    %29 = arith.mulf %27, %28 : vector<8x32xf32>
    %30 = vector.broadcast %11 : vector<1x32xf32> to vector<8x32xf32>
    %31 = arith.addf %29, %30 : vector<8x32xf32>
    %32 = arith.truncf %31 : vector<8x32xf32> to vector<8x32xbf16>
    %c0_15 = arith.constant 0 : index
    %c0_16 = arith.constant 0 : index
    %c0_17 = arith.constant 0 : index
    %33 = vector.load %arg9[%c0_15, %c0_16, %c0_17] : memref<1x32x32xbf16, #tpu.memory_space<vmem>>, vector<1x32x32xbf16>
    %34 = vector.shape_cast %33 : vector<1x32x32xbf16> to vector<32x32xbf16>
    %cst_18 = arith.constant dense<0.000000e+00> : vector<8x32xf32>
    %35 = tpu.matmul %32, %34, %cst_18 {dimension_numbers = #tpu.dot_dimension_numbers<[1], [0], [0], [1], [0, 0, 1, 1], [], []>} : vector<8x32xbf16>, vector<32x32xbf16>, vector<8x32xf32> -> vector<8x32xf32>
    %c0_19 = arith.constant 0 : index
    %c0_20 = arith.constant 0 : index
    %c0_21 = arith.constant 0 : index
    %36 = vector.load %arg10[%c0_19, %c0_20, %c0_21] : memref<1x1x32xf32, #tpu.memory_space<vmem>>, vector<1x1x32xf32>
    %37 = vector.shape_cast %36 : vector<1x1x32xf32> to vector<1x32xf32>
    %38 = vector.broadcast %37 : vector<1x32xf32> to vector<8x32xf32>
    %39 = arith.addf %35, %38 : vector<8x32xf32>
    %c0_22 = arith.constant 0 : index
    %c0_23 = arith.constant 0 : index
    %c0_24 = arith.constant 0 : index
    %40 = vector.load %arg11[%c0_22, %c0_23, %c0_24] : memref<1x32x32xbf16, #tpu.memory_space<vmem>>, vector<1x32x32xbf16>
    %41 = vector.shape_cast %40 : vector<1x32x32xbf16> to vector<32x32xbf16>
    %cst_25 = arith.constant dense<0.000000e+00> : vector<8x32xf32>
    %42 = tpu.matmul %32, %41, %cst_25 {dimension_numbers = #tpu.dot_dimension_numbers<[1], [0], [0], [1], [0, 0, 1, 1], [], []>} : vector<8x32xbf16>, vector<32x32xbf16>, vector<8x32xf32> -> vector<8x32xf32>
    %c0_26 = arith.constant 0 : index
    %c0_27 = arith.constant 0 : index
    %c0_28 = arith.constant 0 : index
    %43 = vector.load %arg12[%c0_26, %c0_27, %c0_28] : memref<1x1x32xf32, #tpu.memory_space<vmem>>, vector<1x1x32xf32>
    %44 = vector.shape_cast %43 : vector<1x1x32xf32> to vector<1x32xf32>
    %45 = vector.broadcast %44 : vector<1x32xf32> to vector<8x32xf32>
    %46 = arith.addf %42, %45 : vector<8x32xf32>
    %c0_29 = arith.constant 0 : index
    %c0_30 = arith.constant 0 : index
    %c0_31 = arith.constant 0 : index
    %47 = vector.load %arg13[%c0_29, %c0_30, %c0_31] : memref<1x32x32xbf16, #tpu.memory_space<vmem>>, vector<1x32x32xbf16>
    %48 = vector.shape_cast %47 : vector<1x32x32xbf16> to vector<32x32xbf16>
    %cst_32 = arith.constant dense<0.000000e+00> : vector<8x32xf32>
    %49 = tpu.matmul %32, %48, %cst_32 {dimension_numbers = #tpu.dot_dimension_numbers<[1], [0], [0], [1], [0, 0, 1, 1], [], []>} : vector<8x32xbf16>, vector<32x32xbf16>, vector<8x32xf32> -> vector<8x32xf32>
    %c0_33 = arith.constant 0 : index
    %c0_34 = arith.constant 0 : index
    %c0_35 = arith.constant 0 : index
    %50 = vector.load %arg14[%c0_33, %c0_34, %c0_35] : memref<1x1x32xf32, #tpu.memory_space<vmem>>, vector<1x1x32xf32>
    %51 = vector.shape_cast %50 : vector<1x1x32xf32> to vector<1x32xf32>
    %52 = vector.broadcast %51 : vector<1x32xf32> to vector<8x32xf32>
    %53 = arith.addf %49, %52 : vector<8x32xf32>
    %cst_36 = arith.constant 0.353553385 : f32
    %54 = vector.broadcast %cst_36 : f32 to vector<8x32xf32>
    %55 = arith.mulf %39, %54 : vector<8x32xf32>
    %56 = vector.shape_cast %55 : vector<8x32xf32> to vector<1x8x32xf32>
    %57 = arith.truncf %56 : vector<1x8x32xf32> to vector<1x8x32xbf16>
    %58 = vector.shape_cast %46 : vector<8x32xf32> to vector<1x8x32xf32>
    %59 = arith.truncf %58 : vector<1x8x32xf32> to vector<1x8x32xbf16>
    %60 = vector.shape_cast %53 : vector<8x32xf32> to vector<1x8x32xf32>
    %61 = arith.truncf %60 : vector<1x8x32xf32> to vector<1x8x32xbf16>
    %62 = vector.extract_strided_slice %57 {offsets = [0, 0, 0], sizes = [1, 8, 8], strides = [1, 1, 1]} : vector<1x8x32xbf16> to vector<1x8x8xbf16>
    %63 = vector.extract_strided_slice %59 {offsets = [0, 0, 0], sizes = [1, 8, 8], strides = [1, 1, 1]} : vector<1x8x32xbf16> to vector<1x8x8xbf16>
    "tpu.trace_start"() <{level = 10 : i32, message = "bqd,bkd->bqk"}> : () -> ()
    %cst_37 = arith.constant dense<0.000000e+00> : vector<1x8x8xf32>
    %64 = tpu.matmul %62, %63, %cst_37 {dimension_numbers = #tpu.dot_dimension_numbers<[2], [2], [1], [1], [0, 0, 0, 1, 1, 1], [0], [0]>} : vector<1x8x8xbf16>, vector<1x8x8xbf16>, vector<1x8x8xf32> -> vector<1x8x8xf32>
    "tpu.trace_stop"() : () -> ()
    %cst_38 = arith.constant dense<0xFF800000> : vector<1x8xf32>
    %65 = vector.multi_reduction <maximumf>, %64, %cst_38 [2] : vector<1x8x8xf32> to vector<1x8xf32>
    %66 = vector.shape_cast %65 : vector<1x8xf32> to vector<1x8x1xf32>
    %67 = vector.broadcast %66 : vector<1x8x1xf32> to vector<1x8x8xf32>
    %68 = arith.subf %64, %67 : vector<1x8x8xf32>
    %69 = math.exp %68 : vector<1x8x8xf32>
    %cst_39 = arith.constant dense<0.000000e+00> : vector<1x8xf32>
    %70 = vector.multi_reduction <add>, %69, %cst_39 [2] : vector<1x8x8xf32> to vector<1x8xf32>
    %71 = vector.shape_cast %70 : vector<1x8xf32> to vector<1x8x1xf32>
    %72 = tpu.reciprocal %71 {approx = true} : vector<1x8x1xf32> -> vector<1x8x1xf32>
    %73 = vector.broadcast %72 : vector<1x8x1xf32> to vector<1x8x8xf32>
    %74 = arith.mulf %69, %73 : vector<1x8x8xf32>
    %75 = arith.truncf %74 : vector<1x8x8xf32> to vector<1x8x8xbf16>
    %76 = vector.extract_strided_slice %61 {offsets = [0, 0, 0], sizes = [1, 8, 8], strides = [1, 1, 1]} : vector<1x8x32xbf16> to vector<1x8x8xbf16>
    "tpu.trace_start"() <{level = 10 : i32, message = "bqk,bkd->bqd"}> : () -> ()
    %cst_40 = arith.constant dense<0.000000e+00> : vector<1x8x8xf32>
    %77 = tpu.matmul %75, %76, %cst_40 {dimension_numbers = #tpu.dot_dimension_numbers<[2], [1], [1], [2], [0, 0, 0, 1, 1, 2], [0], [0]>} : vector<1x8x8xbf16>, vector<1x8x8xbf16>, vector<1x8x8xf32> -> vector<1x8x8xf32>
    "tpu.trace_stop"() : () -> ()
    %78 = vector.extract_strided_slice %57 {offsets = [0, 0, 8], sizes = [1, 8, 8], strides = [1, 1, 1]} : vector<1x8x32xbf16> to vector<1x8x8xbf16>
    %79 = vector.extract_strided_slice %59 {offsets = [0, 0, 8], sizes = [1, 8, 8], strides = [1, 1, 1]} : vector<1x8x32xbf16> to vector<1x8x8xbf16>
    "tpu.trace_start"() <{level = 10 : i32, message = "bqd,bkd->bqk"}> : () -> ()
    %cst_41 = arith.constant dense<0.000000e+00> : vector<1x8x8xf32>
    %80 = tpu.matmul %78, %79, %cst_41 {dimension_numbers = #tpu.dot_dimension_numbers<[2], [2], [1], [1], [0, 0, 0, 1, 1, 1], [0], [0]>} : vector<1x8x8xbf16>, vector<1x8x8xbf16>, vector<1x8x8xf32> -> vector<1x8x8xf32>
    "tpu.trace_stop"() : () -> ()
    %cst_42 = arith.constant dense<0xFF800000> : vector<1x8xf32>
    %81 = vector.multi_reduction <maximumf>, %80, %cst_42 [2] : vector<1x8x8xf32> to vector<1x8xf32>
    %82 = vector.shape_cast %81 : vector<1x8xf32> to vector<1x8x1xf32>
    %83 = vector.broadcast %82 : vector<1x8x1xf32> to vector<1x8x8xf32>
    %84 = arith.subf %80, %83 : vector<1x8x8xf32>
    %85 = math.exp %84 : vector<1x8x8xf32>
    %cst_43 = arith.constant dense<0.000000e+00> : vector<1x8xf32>
    %86 = vector.multi_reduction <add>, %85, %cst_43 [2] : vector<1x8x8xf32> to vector<1x8xf32>
    %87 = vector.shape_cast %86 : vector<1x8xf32> to vector<1x8x1xf32>
    %88 = tpu.reciprocal %87 {approx = true} : vector<1x8x1xf32> -> vector<1x8x1xf32>
    %89 = vector.broadcast %88 : vector<1x8x1xf32> to vector<1x8x8xf32>
    %90 = arith.mulf %85, %89 : vector<1x8x8xf32>
    %91 = arith.truncf %90 : vector<1x8x8xf32> to vector<1x8x8xbf16>
    %92 = vector.extract_strided_slice %61 {offsets = [0, 0, 8], sizes = [1, 8, 8], strides = [1, 1, 1]} : vector<1x8x32xbf16> to vector<1x8x8xbf16>
    "tpu.trace_start"() <{level = 10 : i32, message = "bqk,bkd->bqd"}> : () -> ()
    %cst_44 = arith.constant dense<0.000000e+00> : vector<1x8x8xf32>
    %93 = tpu.matmul %91, %92, %cst_44 {dimension_numbers = #tpu.dot_dimension_numbers<[2], [1], [1], [2], [0, 0, 0, 1, 1, 2], [0], [0]>} : vector<1x8x8xbf16>, vector<1x8x8xbf16>, vector<1x8x8xf32> -> vector<1x8x8xf32>
    "tpu.trace_stop"() : () -> ()
    %94 = vector.extract_strided_slice %57 {offsets = [0, 0, 16], sizes = [1, 8, 8], strides = [1, 1, 1]} : vector<1x8x32xbf16> to vector<1x8x8xbf16>
    %95 = vector.extract_strided_slice %59 {offsets = [0, 0, 16], sizes = [1, 8, 8], strides = [1, 1, 1]} : vector<1x8x32xbf16> to vector<1x8x8xbf16>
    "tpu.trace_start"() <{level = 10 : i32, message = "bqd,bkd->bqk"}> : () -> ()
    %cst_45 = arith.constant dense<0.000000e+00> : vector<1x8x8xf32>
    %96 = tpu.matmul %94, %95, %cst_45 {dimension_numbers = #tpu.dot_dimension_numbers<[2], [2], [1], [1], [0, 0, 0, 1, 1, 1], [0], [0]>} : vector<1x8x8xbf16>, vector<1x8x8xbf16>, vector<1x8x8xf32> -> vector<1x8x8xf32>
    "tpu.trace_stop"() : () -> ()
    %cst_46 = arith.constant dense<0xFF800000> : vector<1x8xf32>
    %97 = vector.multi_reduction <maximumf>, %96, %cst_46 [2] : vector<1x8x8xf32> to vector<1x8xf32>
    %98 = vector.shape_cast %97 : vector<1x8xf32> to vector<1x8x1xf32>
    %99 = vector.broadcast %98 : vector<1x8x1xf32> to vector<1x8x8xf32>
    %100 = arith.subf %96, %99 : vector<1x8x8xf32>
    %101 = math.exp %100 : vector<1x8x8xf32>
    %cst_47 = arith.constant dense<0.000000e+00> : vector<1x8xf32>
    %102 = vector.multi_reduction <add>, %101, %cst_47 [2] : vector<1x8x8xf32> to vector<1x8xf32>
    %103 = vector.shape_cast %102 : vector<1x8xf32> to vector<1x8x1xf32>
    %104 = tpu.reciprocal %103 {approx = true} : vector<1x8x1xf32> -> vector<1x8x1xf32>
    %105 = vector.broadcast %104 : vector<1x8x1xf32> to vector<1x8x8xf32>
    %106 = arith.mulf %101, %105 : vector<1x8x8xf32>
    %107 = arith.truncf %106 : vector<1x8x8xf32> to vector<1x8x8xbf16>
    %108 = vector.extract_strided_slice %61 {offsets = [0, 0, 16], sizes = [1, 8, 8], strides = [1, 1, 1]} : vector<1x8x32xbf16> to vector<1x8x8xbf16>
    "tpu.trace_start"() <{level = 10 : i32, message = "bqk,bkd->bqd"}> : () -> ()
    %cst_48 = arith.constant dense<0.000000e+00> : vector<1x8x8xf32>
    %109 = tpu.matmul %107, %108, %cst_48 {dimension_numbers = #tpu.dot_dimension_numbers<[2], [1], [1], [2], [0, 0, 0, 1, 1, 2], [0], [0]>} : vector<1x8x8xbf16>, vector<1x8x8xbf16>, vector<1x8x8xf32> -> vector<1x8x8xf32>
    "tpu.trace_stop"() : () -> ()
    %110 = vector.extract_strided_slice %57 {offsets = [0, 0, 24], sizes = [1, 8, 8], strides = [1, 1, 1]} : vector<1x8x32xbf16> to vector<1x8x8xbf16>
    %111 = vector.extract_strided_slice %59 {offsets = [0, 0, 24], sizes = [1, 8, 8], strides = [1, 1, 1]} : vector<1x8x32xbf16> to vector<1x8x8xbf16>
    "tpu.trace_start"() <{level = 10 : i32, message = "bqd,bkd->bqk"}> : () -> ()
    %cst_49 = arith.constant dense<0.000000e+00> : vector<1x8x8xf32>
    %112 = tpu.matmul %110, %111, %cst_49 {dimension_numbers = #tpu.dot_dimension_numbers<[2], [2], [1], [1], [0, 0, 0, 1, 1, 1], [0], [0]>} : vector<1x8x8xbf16>, vector<1x8x8xbf16>, vector<1x8x8xf32> -> vector<1x8x8xf32>
    "tpu.trace_stop"() : () -> ()
    %cst_50 = arith.constant dense<0xFF800000> : vector<1x8xf32>
    %113 = vector.multi_reduction <maximumf>, %112, %cst_50 [2] : vector<1x8x8xf32> to vector<1x8xf32>
    %114 = vector.shape_cast %113 : vector<1x8xf32> to vector<1x8x1xf32>
    %115 = vector.broadcast %114 : vector<1x8x1xf32> to vector<1x8x8xf32>
    %116 = arith.subf %112, %115 : vector<1x8x8xf32>
    %117 = math.exp %116 : vector<1x8x8xf32>
    %cst_51 = arith.constant dense<0.000000e+00> : vector<1x8xf32>
    %118 = vector.multi_reduction <add>, %117, %cst_51 [2] : vector<1x8x8xf32> to vector<1x8xf32>
    %119 = vector.shape_cast %118 : vector<1x8xf32> to vector<1x8x1xf32>
    %120 = tpu.reciprocal %119 {approx = true} : vector<1x8x1xf32> -> vector<1x8x1xf32>
    %121 = vector.broadcast %120 : vector<1x8x1xf32> to vector<1x8x8xf32>
    %122 = arith.mulf %117, %121 : vector<1x8x8xf32>
    %123 = arith.truncf %122 : vector<1x8x8xf32> to vector<1x8x8xbf16>
    %124 = vector.extract_strided_slice %61 {offsets = [0, 0, 24], sizes = [1, 8, 8], strides = [1, 1, 1]} : vector<1x8x32xbf16> to vector<1x8x8xbf16>
    "tpu.trace_start"() <{level = 10 : i32, message = "bqk,bkd->bqd"}> : () -> ()
    %cst_52 = arith.constant dense<0.000000e+00> : vector<1x8x8xf32>
    %125 = tpu.matmul %123, %124, %cst_52 {dimension_numbers = #tpu.dot_dimension_numbers<[2], [1], [1], [2], [0, 0, 0, 1, 1, 2], [0], [0]>} : vector<1x8x8xbf16>, vector<1x8x8xbf16>, vector<1x8x8xf32> -> vector<1x8x8xf32>
    "tpu.trace_stop"() : () -> ()
    %126 = tpu.concatenate %77, %93, %109, %125 in 2 : vector<1x8x8xf32>, vector<1x8x8xf32>, vector<1x8x8xf32>, vector<1x8x8xf32> -> vector<1x8x32xf32>
    %127 = vector.shape_cast %126 : vector<1x8x32xf32> to vector<8x32xf32>
    %128 = arith.truncf %127 : vector<8x32xf32> to vector<8x32xbf16>
    %c0_53 = arith.constant 0 : index
    %c0_54 = arith.constant 0 : index
    %c0_55 = arith.constant 0 : index
    %129 = vector.load %arg15[%c0_53, %c0_54, %c0_55] : memref<1x32x32xbf16, #tpu.memory_space<vmem>>, vector<1x32x32xbf16>
    %130 = vector.shape_cast %129 : vector<1x32x32xbf16> to vector<32x32xbf16>
    %cst_56 = arith.constant dense<0.000000e+00> : vector<8x32xf32>
    %131 = tpu.matmul %128, %130, %cst_56 {dimension_numbers = #tpu.dot_dimension_numbers<[1], [0], [0], [1], [0, 0, 1, 1], [], []>} : vector<8x32xbf16>, vector<32x32xbf16>, vector<8x32xf32> -> vector<8x32xf32>
    %c0_57 = arith.constant 0 : index
    %c0_58 = arith.constant 0 : index
    %c0_59 = arith.constant 0 : index
    %132 = vector.load %arg16[%c0_57, %c0_58, %c0_59] : memref<1x1x32xf32, #tpu.memory_space<vmem>>, vector<1x1x32xf32>
    %133 = vector.shape_cast %132 : vector<1x1x32xf32> to vector<1x32xf32>
    %134 = vector.broadcast %133 : vector<1x32xf32> to vector<8x32xf32>
    %135 = arith.addf %131, %134 : vector<8x32xf32>
    %136 = arith.addf %135, %3 : vector<8x32xf32>
    %c0_60 = arith.constant 0 : index
    %c0_61 = arith.constant 0 : index
    %c0_62 = arith.constant 0 : index
    %137 = vector.load %arg7[%c0_60, %c0_61, %c0_62] : memref<1x1x32xf32, #tpu.memory_space<vmem>>, vector<1x1x32xf32>
    %138 = vector.shape_cast %137 : vector<1x1x32xf32> to vector<1x32xf32>
    %c0_63 = arith.constant 0 : index
    %c0_64 = arith.constant 0 : index
    %c0_65 = arith.constant 0 : index
    %139 = vector.load %arg8[%c0_63, %c0_64, %c0_65] : memref<1x1x32xf32, #tpu.memory_space<vmem>>, vector<1x1x32xf32>
    %140 = vector.shape_cast %139 : vector<1x1x32xf32> to vector<1x32xf32>
    %cst_66 = arith.constant dense<0.000000e+00> : vector<8xf32>
    %141 = vector.multi_reduction <add>, %136, %cst_66 [1] : vector<8x32xf32> to vector<8xf32>
    %142 = vector.shape_cast %141 : vector<8xf32> to vector<8x1xf32>
    %cst_67 = arith.constant 3.200000e+01 : f32
    %143 = vector.broadcast %cst_67 : f32 to vector<8x1xf32>
    %144 = arith.divf %142, %143 : vector<8x1xf32>
    %145 = vector.broadcast %144 : vector<8x1xf32> to vector<8x32xf32>
    %146 = arith.subf %136, %145 : vector<8x32xf32>
    %147 = arith.mulf %146, %146 : vector<8x32xf32>
    %cst_68 = arith.constant dense<0.000000e+00> : vector<8xf32>
    %148 = vector.multi_reduction <add>, %147, %cst_68 [1] : vector<8x32xf32> to vector<8xf32>
    %149 = vector.shape_cast %148 : vector<8xf32> to vector<8x1xf32>
    %cst_69 = arith.constant 3.200000e+01 : f32
    %150 = vector.broadcast %cst_69 : f32 to vector<8x1xf32>
    %151 = arith.divf %149, %150 : vector<8x1xf32>
    %cst_70 = arith.constant 9.99999996E-13 : f32
    %152 = vector.broadcast %cst_70 : f32 to vector<8x1xf32>
    %153 = arith.addf %151, %152 : vector<8x1xf32>
    %154 = math.rsqrt %153 : vector<8x1xf32>
    %155 = vector.broadcast %154 : vector<8x1xf32> to vector<8x32xf32>
    %156 = arith.mulf %146, %155 : vector<8x32xf32>
    %157 = vector.broadcast %138 : vector<1x32xf32> to vector<8x32xf32>
    %158 = arith.mulf %156, %157 : vector<8x32xf32>
    %159 = vector.broadcast %140 : vector<1x32xf32> to vector<8x32xf32>
    %160 = arith.addf %158, %159 : vector<8x32xf32>
    %161 = arith.truncf %160 : vector<8x32xf32> to vector<8x32xbf16>
    %c0_71 = arith.constant 0 : index
    %c0_72 = arith.constant 0 : index
    %c0_73 = arith.constant 0 : index
    %162 = vector.load %arg17[%c0_71, %c0_72, %c0_73] : memref<1x32x64xbf16, #tpu.memory_space<vmem>>, vector<1x32x64xbf16>
    %163 = vector.shape_cast %162 : vector<1x32x64xbf16> to vector<32x64xbf16>
    %cst_74 = arith.constant dense<0.000000e+00> : vector<8x64xf32>
    %164 = tpu.matmul %161, %163, %cst_74 {dimension_numbers = #tpu.dot_dimension_numbers<[1], [0], [0], [1], [0, 0, 1, 1], [], []>} : vector<8x32xbf16>, vector<32x64xbf16>, vector<8x64xf32> -> vector<8x64xf32>
    %c0_75 = arith.constant 0 : index
    %c0_76 = arith.constant 0 : index
    %c0_77 = arith.constant 0 : index
    %165 = vector.load %arg18[%c0_75, %c0_76, %c0_77] : memref<1x1x64xf32, #tpu.memory_space<vmem>>, vector<1x1x64xf32>
    %166 = vector.shape_cast %165 : vector<1x1x64xf32> to vector<1x64xf32>
    %167 = vector.broadcast %166 : vector<1x64xf32> to vector<8x64xf32>
    %168 = arith.addf %164, %167 : vector<8x64xf32>
    %cst_78 = arith.constant 5.000000e-01 : f32
    %169 = vector.broadcast %cst_78 : f32 to vector<8x64xf32>
    %170 = arith.mulf %169, %168 : vector<8x64xf32>
    %cst_79 = arith.constant 0.707106769 : f32
    %171 = vector.broadcast %cst_79 : f32 to vector<8x64xf32>
    %172 = arith.mulf %168, %171 : vector<8x64xf32>
    %173 = math.erf %172 : vector<8x64xf32>
    %cst_80 = arith.constant 1.000000e+00 : f32
    %174 = vector.broadcast %cst_80 : f32 to vector<8x64xf32>
    %175 = arith.addf %174, %173 : vector<8x64xf32>
    %176 = arith.mulf %170, %175 : vector<8x64xf32>
    %177 = arith.truncf %176 : vector<8x64xf32> to vector<8x64xbf16>
    %c0_81 = arith.constant 0 : index
    %c0_82 = arith.constant 0 : index
    %c0_83 = arith.constant 0 : index
    %178 = vector.load %arg19[%c0_81, %c0_82, %c0_83] : memref<1x64x32xbf16, #tpu.memory_space<vmem>>, vector<1x64x32xbf16>
    %179 = vector.shape_cast %178 : vector<1x64x32xbf16> to vector<64x32xbf16>
    %cst_84 = arith.constant dense<0.000000e+00> : vector<8x32xf32>
    %180 = tpu.matmul %177, %179, %cst_84 {dimension_numbers = #tpu.dot_dimension_numbers<[1], [0], [0], [1], [0, 0, 1, 1], [], []>} : vector<8x64xbf16>, vector<64x32xbf16>, vector<8x32xf32> -> vector<8x32xf32>
    %c0_85 = arith.constant 0 : index
    %c0_86 = arith.constant 0 : index
    %c0_87 = arith.constant 0 : index
    %181 = vector.load %arg20[%c0_85, %c0_86, %c0_87] : memref<1x1x32xf32, #tpu.memory_space<vmem>>, vector<1x1x32xf32>
    %182 = vector.shape_cast %181 : vector<1x1x32xf32> to vector<1x32xf32>
    %183 = vector.broadcast %182 : vector<1x32xf32> to vector<8x32xf32>
    %184 = arith.addf %180, %183 : vector<8x32xf32>
    %185 = arith.addf %184, %136 : vector<8x32xf32>
    %c0_88 = arith.constant 0 : index
    %c0_89 = arith.constant 0 : index
    %186 = vector.load %arg22[%c0_88, %c0_89] : memref<8x32xf32, #tpu.memory_space<vmem>>, vector<8x32xf32>
    tpu.vector_store %arg22[%c0_88, %c0_89], %185 {strides = array<i32>} : memref<8x32xf32, #tpu.memory_space<vmem>>, vector<8x32xf32>,
    %c3_i32 = arith.constant 3 : i32
    %187 = arith.cmpi eq, %arg1, %c3_i32 : i32
    %188 = arith.extui %187 : i1 to i32
    %c0_i32_90 = arith.constant 0 : i32
    %189 = arith.cmpi ne, %188, %c0_i32_90 : i32
    scf.if %189 {
      %190 = vector.shape_cast %185 : vector<8x32xf32> to vector<1x8x32xf32>
      %c0_91 = arith.constant 0 : index
      %c0_92 = arith.constant 0 : index
      %c0_93 = arith.constant 0 : index
      %191 = vector.load %arg21[%c0_91, %c0_92, %c0_93] : memref<1x8x32xf32, #tpu.memory_space<vmem>>, vector<1x8x32xf32>
      tpu.vector_store %arg21[%c0_91, %c0_92, %c0_93], %190 {strides = array<i32>} : memref<1x8x32xf32, #tpu.memory_space<vmem>>, vector<1x8x32xf32>,
    } else {
    }
    return
  }
  func.func @transform_0(%arg0: i32, %arg1: i32, %arg2: memref<4xi32, #tpu.memory_space<smem>>) -> (i32, i32, i32) {
    %c0_i32 = arith.constant 0 : i32
    %c0_i32_0 = arith.constant 0 : i32
    %c0_i32_1 = arith.constant 0 : i32
    return %arg0, %c0_i32, %c0_i32_0 : i32, i32, i32
  }
  func.func @transform_1(%arg0: i32, %arg1: i32, %arg2: memref<4xi32, #tpu.memory_space<smem>>) -> (i32, i32, i32) {
    %c0_i32 = arith.constant 0 : i32
    %c0_i32_0 = arith.constant 0 : i32
    %c0_i32_1 = arith.constant 0 : i32
    return %arg1, %c0_i32, %c0_i32_0 : i32, i32, i32
  }
  func.func @transform_2(%arg0: i32, %arg1: i32, %arg2: memref<4xi32, #tpu.memory_space<smem>>) -> (i32, i32, i32) {
    %0 = arith.index_cast %arg1 : i32 to index
    %1 = memref.load %arg2[%0] : memref<4xi32, #tpu.memory_space<smem>>
    %c0_i32 = arith.constant 0 : i32
    %c0_i32_0 = arith.constant 0 : i32
    %c0_i32_1 = arith.constant 0 : i32
    return %1, %c0_i32, %c0_i32_0 : i32, i32, i32
  }
  func.func @transform_3(%arg0: i32, %arg1: i32, %arg2: memref<4xi32, #tpu.memory_space<smem>>) -> (i32, i32, i32) {
    %0 = arith.index_cast %arg1 : i32 to index
    %1 = memref.load %arg2[%0] : memref<4xi32, #tpu.memory_space<smem>>
    %c0_i32 = arith.constant 0 : i32
    %c0_i32_0 = arith.constant 0 : i32
    %c0_i32_1 = arith.constant 0 : i32
    return %1, %c0_i32, %c0_i32_0 : i32, i32, i32
  }
  func.func @transform_4(%arg0: i32, %arg1: i32, %arg2: memref<4xi32, #tpu.memory_space<smem>>) -> (i32, i32, i32) {
    %0 = arith.index_cast %arg1 : i32 to index
    %1 = memref.load %arg2[%0] : memref<4xi32, #tpu.memory_space<smem>>
    %c0_i32 = arith.constant 0 : i32
    %c0_i32_0 = arith.constant 0 : i32
    %c0_i32_1 = arith.constant 0 : i32
    return %1, %c0_i32, %c0_i32_0 : i32, i32, i32
  }
  func.func @transform_5(%arg0: i32, %arg1: i32, %arg2: memref<4xi32, #tpu.memory_space<smem>>) -> (i32, i32, i32) {
    %0 = arith.index_cast %arg1 : i32 to index
    %1 = memref.load %arg2[%0] : memref<4xi32, #tpu.memory_space<smem>>
    %c0_i32 = arith.constant 0 : i32
    %c0_i32_0 = arith.constant 0 : i32
    %c0_i32_1 = arith.constant 0 : i32
    return %1, %c0_i32, %c0_i32_0 : i32, i32, i32
  }
  func.func @transform_6(%arg0: i32, %arg1: i32, %arg2: memref<4xi32, #tpu.memory_space<smem>>) -> (i32, i32, i32) {
    %0 = arith.index_cast %arg1 : i32 to index
    %1 = memref.load %arg2[%0] : memref<4xi32, #tpu.memory_space<smem>>
    %c0_i32 = arith.constant 0 : i32
    %c0_i32_0 = arith.constant 0 : i32
    %c0_i32_1 = arith.constant 0 : i32
    return %1, %c0_i32, %c0_i32_0 : i32, i32, i32
  }
  func.func @transform_7(%arg0: i32, %arg1: i32, %arg2: memref<4xi32, #tpu.memory_space<smem>>) -> (i32, i32, i32) {
    %0 = arith.index_cast %arg1 : i32 to index
    %1 = memref.load %arg2[%0] : memref<4xi32, #tpu.memory_space<smem>>
    %c0_i32 = arith.constant 0 : i32
    %c0_i32_0 = arith.constant 0 : i32
    %c0_i32_1 = arith.constant 0 : i32
    return %1, %c0_i32, %c0_i32_0 : i32, i32, i32
  }
  func.func @transform_8(%arg0: i32, %arg1: i32, %arg2: memref<4xi32, #tpu.memory_space<smem>>) -> (i32, i32, i32) {
    %0 = arith.index_cast %arg1 : i32 to index
    %1 = memref.load %arg2[%0] : memref<4xi32, #tpu.memory_space<smem>>
    %c0_i32 = arith.constant 0 : i32
    %c0_i32_0 = arith.constant 0 : i32
    %c0_i32_1 = arith.constant 0 : i32
    return %1, %c0_i32, %c0_i32_0 : i32, i32, i32
  }
  func.func @transform_9(%arg0: i32, %arg1: i32, %arg2: memref<4xi32, #tpu.memory_space<smem>>) -> (i32, i32, i32) {
    %0 = arith.index_cast %arg1 : i32 to index
    %1 = memref.load %arg2[%0] : memref<4xi32, #tpu.memory_space<smem>>
    %c0_i32 = arith.constant 0 : i32
    %c0_i32_0 = arith.constant 0 : i32
    %c0_i32_1 = arith.constant 0 : i32
    return %1, %c0_i32, %c0_i32_0 : i32, i32, i32
  }
  func.func @transform_10(%arg0: i32, %arg1: i32, %arg2: memref<4xi32, #tpu.memory_space<smem>>) -> (i32, i32, i32) {
    %0 = arith.index_cast %arg1 : i32 to index
    %1 = memref.load %arg2[%0] : memref<4xi32, #tpu.memory_space<smem>>
    %c0_i32 = arith.constant 0 : i32
    %c0_i32_0 = arith.constant 0 : i32
    %c0_i32_1 = arith.constant 0 : i32
    return %1, %c0_i32, %c0_i32_0 : i32, i32, i32
  }
  func.func @transform_11(%arg0: i32, %arg1: i32, %arg2: memref<4xi32, #tpu.memory_space<smem>>) -> (i32, i32, i32) {
    %0 = arith.index_cast %arg1 : i32 to index
    %1 = memref.load %arg2[%0] : memref<4xi32, #tpu.memory_space<smem>>
    %c0_i32 = arith.constant 0 : i32
    %c0_i32_0 = arith.constant 0 : i32
    %c0_i32_1 = arith.constant 0 : i32
    return %1, %c0_i32, %c0_i32_0 : i32, i32, i32
  }
  func.func @transform_12(%arg0: i32, %arg1: i32, %arg2: memref<4xi32, #tpu.memory_space<smem>>) -> (i32, i32, i32) {
    %0 = arith.index_cast %arg1 : i32 to index
    %1 = memref.load %arg2[%0] : memref<4xi32, #tpu.memory_space<smem>>
    %c0_i32 = arith.constant 0 : i32
    %c0_i32_0 = arith.constant 0 : i32
    %c0_i32_1 = arith.constant 0 : i32
    return %1, %c0_i32, %c0_i32_0 : i32, i32, i32
  }
  func.func @transform_13(%arg0: i32, %arg1: i32, %arg2: memref<4xi32, #tpu.memory_space<smem>>) -> (i32, i32, i32) {
    %0 = arith.index_cast %arg1 : i32 to index
    %1 = memref.load %arg2[%0] : memref<4xi32, #tpu.memory_space<smem>>
    %c0_i32 = arith.constant 0 : i32
    %c0_i32_0 = arith.constant 0 : i32
    %c0_i32_1 = arith.constant 0 : i32
    return %1, %c0_i32, %c0_i32_0 : i32, i32, i32
  }
  func.func @transform_14(%arg0: i32, %arg1: i32, %arg2: memref<4xi32, #tpu.memory_space<smem>>) -> (i32, i32, i32) {
    %0 = arith.index_cast %arg1 : i32 to index
    %1 = memref.load %arg2[%0] : memref<4xi32, #tpu.memory_space<smem>>
    %c0_i32 = arith.constant 0 : i32
    %c0_i32_0 = arith.constant 0 : i32
    %c0_i32_1 = arith.constant 0 : i32
    return %1, %c0_i32, %c0_i32_0 : i32, i32, i32
  }
  func.func @transform_15(%arg0: i32, %arg1: i32, %arg2: memref<4xi32, #tpu.memory_space<smem>>) -> (i32, i32, i32) {
    %0 = arith.index_cast %arg1 : i32 to index
    %1 = memref.load %arg2[%0] : memref<4xi32, #tpu.memory_space<smem>>
    %c0_i32 = arith.constant 0 : i32
    %c0_i32_0 = arith.constant 0 : i32
    %c0_i32_1 = arith.constant 0 : i32
    return %1, %c0_i32, %c0_i32_0 : i32, i32, i32
  }
  func.func @transform_16(%arg0: i32, %arg1: i32, %arg2: memref<4xi32, #tpu.memory_space<smem>>) -> (i32, i32, i32) {
    %0 = arith.index_cast %arg1 : i32 to index
    %1 = memref.load %arg2[%0] : memref<4xi32, #tpu.memory_space<smem>>
    %c0_i32 = arith.constant 0 : i32
    %c0_i32_0 = arith.constant 0 : i32
    %c0_i32_1 = arith.constant 0 : i32
    return %1, %c0_i32, %c0_i32_0 : i32, i32, i32
  }
  func.func @transform_17(%arg0: i32, %arg1: i32, %arg2: memref<4xi32, #tpu.memory_space<smem>>) -> (i32, i32, i32) {
    %0 = arith.index_cast %arg1 : i32 to index
    %1 = memref.load %arg2[%0] : memref<4xi32, #tpu.memory_space<smem>>
    %c0_i32 = arith.constant 0 : i32
    %c0_i32_0 = arith.constant 0 : i32
    %c0_i32_1 = arith.constant 0 : i32
    return %1, %c0_i32, %c0_i32_0 : i32, i32, i32
  }
  func.func @transform_18(%arg0: i32, %arg1: i32, %arg2: memref<4xi32, #tpu.memory_space<smem>>) -> (i32, i32, i32) {
    %c0_i32 = arith.constant 0 : i32
    %c0_i32_0 = arith.constant 0 : i32
    %c0_i32_1 = arith.constant 0 : i32
    return %arg0, %c0_i32, %c0_i32_0 : i32, i32, i32
  }
}

</mosaic_0001>

<bundles_post_ra>
// kernel: tpu_custom_call.1
= control target key start
LH: loop header
LB: loop body
LE: loop exit
PB: predicated region body
PF: predicated region fallthrough
CT: control target
= control target key end

     0   :  { %s4086_s0 = inlined_call_operand.hbm [shape: s32[4], index: 0, kind: input, shape index: {}]   ;;  %s4087_s1 = inlined_call_operand.hbm [shape: f32[2,8,32], index: 1, kind: input, shape index: {}]   ;;  %s4088_s2 = inlined_call_operand.hbm [shape: f32[4,1,32], index: 2, kind: input, shape index: {}]   ;;  %s4089_s3 = inlined_call_operand.vmem [shape: f32[3,1,32], index: 3, kind: input, shape index: {}]   ;;  %s4090_s4 = inlined_call_operand.vmem [shape: f32[3,1,32], index: 4, kind: input, shape index: {}]   ;;  %s4091_s5 = inlined_call_operand.vmem [shape: f32[3,1,32], index: 5, kind: input, shape index: {}]   ;;  %s4092_s6 = inlined_call_operand.hbm [shape: f32[3,1,32], index: 6, kind: input, shape index: {}]   ;;  %s4093_s7 = inlined_call_operand.vmem [shape: bf16[3,32,32], index: 7, kind: input, shape index: {}]   ;;  %s4094_s8 = inlined_call_operand.vmem [shape: f32[3,1,32], index: 8, kind: input, shape index: {}]   ;;  %s4095_s9 = inlined_call_operand.vmem [shape: bf16[3,32,32], index: 9, kind: input, shape index: {}]   ;;  %s4096_s10 = inlined_call_operand.vmem [shape: f32[3,1,32], index: 10, kind: input, shape index: {}]   ;;  %s4097_s11 = inlined_call_operand.vmem [shape: bf16[3,32,32], index: 11, kind: input, shape index: {}]   ;;  %s4098_s12 = inlined_call_operand.vmem [shape: f32[3,1,32], index: 12, kind: input, shape index: {}]   ;;  %s4099_s13 = inlined_call_operand.hbm [shape: bf16[3,32,32], index: 13, kind: input, shape index: {}]   ;;  %s4100_s14 = inlined_call_operand.vmem [shape: f32[3,1,32], index: 14, kind: input, shape index: {}]   ;;  %s4101_s15 = inlined_call_operand.hbm [shape: bf16[3,32,64], index: 15, kind: input, shape index: {}]   ;;  %s4102_s16 = inlined_call_operand.vmem [shape: f32[3,1,64], index: 16, kind: input, shape index: {}]   ;;  %s4103_s17 = inlined_call_operand.vmem [shape: bf16[3,64,32], index: 17, kind: input, shape index: {}]   ;;  %s4104_s18 = inlined_call_operand.vmem [shape: f32[3,1,32], index: 18, kind: input, shape index: {}]   ;;  %s4105_s19 = inlined_call_operand.hbm [shape: f32[2,8,32], index: 19, kind: output, shape index: {}]  }
   0x1   :  { %4157 = sst [smem:[#allocation61_spill]] %s4086_s0  ;;  %s3151_s0 = smov [#allocation4]  }
   0x2   :  { %4158 = sst [smem:[#allocation62_spill]] %s4087_s1 }
   0x3   :  { %4159 = sst [smem:[#allocation63_spill]] %s4088_s2 }
   0x4   :  { %4160 = sst [smem:[#allocation64_spill]] %s4089_s3 }
   0x5   :  { %4161 = sst [smem:[#allocation65_spill]] %s4090_s4 }
   0x6   :  { %4162 = sst [smem:[#allocation66_spill]] %s4091_s5 }
   0x7   :  { %4163 = sst [smem:[#allocation67_spill]] %s4092_s6 }
   0x8   :  { %4164 = sst [smem:[#allocation68_spill]] %s4093_s7 }
   0x9   :  { %4165 = sst [smem:[#allocation69_spill]] %s4094_s8 }
   0xa   :  { %4166 = sst [smem:[#allocation70_spill]] %s4095_s9 }
   0xb   :  { %4167 = sst [smem:[#allocation71_spill]] %s4096_s10 }
   0xc   :  { %4168 = sst [smem:[#allocation72_spill]] %s4097_s11 }
   0xd   :  { %4169 = sst [smem:[#allocation73_spill]] %s4098_s12 }
   0xe   :  { %4170 = sst [smem:[#allocation74_spill]] %s4099_s13 }
   0xf   :  { %4171 = sst [smem:[#allocation75_spill]] %s4100_s14 }
  0x10   :  { %4172 = sst [smem:[#allocation76_spill]] %s4101_s15 }
  0x11   :  { %4173 = sst [smem:[#allocation77_spill]] %s4102_s16 }
  0x12   :  { %4174 = sst [smem:[#allocation78_spill]] %s4103_s17 }
  0x13   :  { %4175 = sst [smem:[#allocation79_spill]] %s4104_s18 }
  0x14   :  { %4176 = sst [smem:[#allocation80_spill]] %s4105_s19 }
  0x15   :  { %s4177_s12 = sld [smem:[#allocation61_spill]] }
  0x1b   :  { %25 = dma.hbm_to_smem %s4177_s12, 16, %s3151_s0, [#allocation3] }
  0x1c   :  { %3045 = dma.done.wait [#allocation3], 16 }
  0x1d   :  { %3046 = vsyncadd [#allocation3], 4294967280 }
  0x1e   :  { %27 = sfence }
  0x1f   :  { %28 = vsyncpa [#allocation6], 0 }
  0x20   :  { %30 = vsyncpa [#allocation6 + $0x1], 0 }
  0x21   :  { %31 = vsyncpa [#allocation9], 0 }
  0x22   :  { %33 = vsyncpa [#allocation9 + $0x1], 0 }
  0x23   :  { %34 = vsyncpa [#allocation12], 0 }
  0x24   :  { %36 = vsyncpa [#allocation12 + $0x1], 0 }
  0x25   :  { %37 = vsyncpa [#allocation7], 0 }
  0x26   :  { %39 = vsyncpa [#allocation7 + $0x1], 0  ;;  %s3271_s21 = smov 0   ;;  %s3273_s1 = smov 0  }
  0x27   :  { %s3275_s22 = smov 0   ;;  %s3277_s2 = smov 0  }
  0x28   :  { %s3279_s12 = smov 0   ;;  %s3281_s23 = smov 0  }
  0x29   :  { %s3283_s24 = smov 0   ;;  %s3285_s25 = smov 0  }
  0x2a   :  { %s3287_s3 = smov 0   ;;  %s3289_s26 = smov 0  }
  0x2b   :  { %s3291_s27 = smov 0   ;;  %s3293_s28 = smov 0  }
  0x2c   :  { %s3295_s29 = smov 0   ;;  %s3297_s0 = smov 0  }
  0x2d   :  { %s3299_s30 = smov 0   ;;  %s3301_s20 = smov 0  }
  0x2e   :  { %s3303_s19 = smov 0   ;;  %s3305_s18 = smov 0  }
  0x2f   :  { %s3307_s17 = smov 0   ;;  %s3309_s16 = smov 0  }
  0x30 LB: > { %4178 = sst [smem:[#allocation28_spill]] %s3073_s21  ;;  %s3370_s14 = sadd.s32 4294967295, %s3149_s16   ;;  %s3149_s16 = sphi %s3309_s16, %s45_s16   ;;  %s3145_s17 = sphi %s3307_s17, %s4339_s17   ;;  %s3141_s18 = sphi %s3305_s18, %s4338_s18   ;;  %s3137_s19 = sphi %s3303_s19, %s4337_s19   ;;  %s3133_s20 = sphi %s3301_s20, %s4336_s20   ;;  %s3129_s30 = sphi %s3299_s30, %s4335_s30   ;;  %s3125_s0 = sphi %s3297_s0, %s4334_s0   ;;  %s3121_s29 = sphi %s3295_s29, %s4333_s29   ;;  %s3117_s28 = sphi %s3293_s28, %s4341_s28   ;;  %s3113_s27 = sphi %s3291_s27, %s4331_s27   ;;  %s3109_s26 = sphi %s3289_s26, %s4330_s26   ;;  %s3105_s3 = sphi %s3287_s3, %s4329_s3   ;;  %s3101_s25 = sphi %s3285_s25, %s4328_s25   ;;  %s3097_s24 = sphi %s3283_s24, %s4327_s24   ;;  %s3093_s23 = sphi %s3281_s23, %s4326_s23   ;;  %s3089_s12 = sphi %s3279_s12, %s4325_s12   ;;  %s3085_s2 = sphi %s3277_s2, %s4324_s2   ;;  %s3081_s22 = sphi %s3275_s22, %s4323_s22   ;;  %s3077_s1 = sphi %s3273_s1, %s4322_s1   ;;  %s3073_s21 = sphi %s3271_s21, %s4321_s21  }
  0x31   : > { %4179 = sst [smem:[#allocation29_spill]] %s3077_s1  ;;  %p4119_p1 = scmp.eq.s32.totalorder %s3149_s16, 0 }
  0x32   : > { %4180 = sst [smem:[#allocation30_spill]] %s3081_s22  ;;  %p4113_p2 = scmp.eq.s32.totalorder %s3370_s14, 0 }
  0x33   : > { %4181 = sst [smem:[#allocation31_spill]] %s3089_s12  ;;  %s90_s10 = sadd.s32 1, %s3117_s28 }
  0x34   : > { %4182 = sst [smem:[#allocation32_spill]] %s3093_s23  ;;  %p97_p3 = scmp.ne.s32.totalorder %s3117_s28, %s3113_s27 }
  0x35   : > { %4183 = sst [smem:[#allocation33_spill]] %s3101_s25  ;;  %p103_p4 = scmp.ne.s32.totalorder %s3113_s27, %s3109_s26 }
  0x36   : > { %4184 = sst [smem:[#allocation34_spill]] %s3105_s3  ;;  %p99_p6 = por %p97_p3, %p4119_p1 }
  0x37   : > { %4185 = sst [smem:[#allocation35_spill]] %s3113_s27  ;;  %p3393_p7 = por %p103_p4, %p4113_p2 }
  0x38   : > { %4186 = sst [smem:[#allocation36_spill]] %s3117_s28  ;;  %p4112_p8 = scmp.lt.s32.totalorder %s3149_s16, 8 }
  0x39   : > { %4187 = sst [smem:[#allocation37_spill]] %s3121_s29  ;;  %s4114_s5 = sand.u32 1, %s3149_s16  }
  0x3a   : > { %4188 = sst [smem:[#allocation38_spill]] %s3125_s0  ;;  %s621_s4 = sand.u32 1, %s3117_s28  }
  0x3b   : > { %4189 = sst [smem:[#allocation39_spill]] %s3129_s30  ;;  %s622_s15 = scalar_lea.vmem [#allocation8], %s621_s4 }
  0x3c   : > { %4190 = sst [smem:[#allocation40_spill]] %s3133_s20  ;;  %s2330_s20 = sshll.u32 %s3141_s18, 4 }
  0x3d   : > { %4191 = sst [smem:[#allocation41_spill]] %s3137_s19  ;;  %s54_s19 = sadd.s32 1, %s3141_s18 }
  0x3e   : > { %4192 = sst [smem:[#allocation42_spill]] %s3141_s18  ;;  %p3373_p0 = scmp.ge.s32.totalorder %s54_s19, 4 }
  0x3f   : > { %4193 = sst [smem:[#allocation43_spill]] %s3145_s17  ;;  %s629_s6 = sshll.u32 %s622_s15, 4  ;;  %s630_s6 = int_to_ptr.vmem [resolvable:$true] %s629_s6 }
  0x40   : > { %4194 = sst [smem:[#allocation44_spill]] %s3149_s16  ;;  %s4343_s19 = smov (%p3373_p0, %s54_s19), 0 }
  0x41   : > { %s4195_s11 = scalar_select %p3373_p0, 1, 0 }
  0x42   : > { %4196 = sst [smem:[#allocation45_spill]] %s4343_s19  ;;  %s87_s9 = ssub.s32 %s3141_s18, %s4343_s19 }
  0x43   : > { %p88_p5 = scmp.eq.s32.totalorder %s87_s9, 0  ;;  %s4200_s21 = sld [smem:[#allocation63_spill]] }
  0x44   : > { %s4197_s8 = scalar_select %p3393_p7, 1, 0 }
  0x45   : > { %s3399_s7 = scalar_select %p88_p5, %s3117_s28, %s90_s10  }
  0x46   : > { %4198 = sst [smem:[#allocation46_spill]] %s4197_s8  ;;  %p3409_p9 = pnand %p4112_p8, %p99_p6 }
  0x47   : > { %4199 = sst [smem:[#allocation47_spill]] %s3399_s7  ;;  %p2338_p10 = scmp.ge.s32.totalorder %s3149_s16, 1 }
  0x48   : > { %p808_p11 = scmp.lt.s32.totalorder %s3149_s16, 9  ;;  %s3417_s10 = scalar_lea.sflag [#allocation9], %s4114_s5 }
  0x49   : > { %s627_s22 = scalar_lea.hbm %s4200_s21, %s2330_s20  ;;  %p2801_p12 = pneg %p3409_p9 }
  0x4a   : > { %s2812_s4 = scalar_lea.vmem %s630_s6, 16  ;;  %s3152_s15 = smov [#allocation8]  }
  0x4b   : > { %p2813_p13 = scmp.ne.s32.totalorder %s630_s6, %s2812_s4  ;;  %s2817_s21 = sshll.u32 %s3152_s15, 4  ;;  %s2818_s21 = int_to_ptr.vmem [resolvable:$false] %s2817_s21 }
  0x4c   : > { %s2819_s27 = scalar_lea.vmem %s2818_s21, 32  ;;  %p2820_p5 = scmp.lt.s32.totalorder %s630_s6, %s2818_s21 }
  0x4d   : > { %p2815_p3 = pnand %p2813_p13, %p2801_p12  ;;  %p2821_p6 = scmp.lt.s32.totalorder %s2819_s27, %s2812_s4 }
  0x4f   : > { %p2816_p4 = pneg %p2815_p3  ;;  %p2822_p8 = por %p2821_p6, %p2820_p5 }
  0x51   : > { %p2823_p2 = pnand %p2822_p8, %p2816_p4 }
  0x53   : > { %2826 = shalt.err (!%p2823_p2)
}
  0x54   : > { %2562 = dma.hbm_to_vmem [thread:$0]  (!%p3409_p9), %s627_s22, 16, %s630_s6, %s3417_s10  }
  0x55   : > { %p3428_p2 = pnand %p2338_p10, %p808_p11  ;;  %s393_s26 = sld [smem:[#allocation4 + %s3141_s18]] }
  0x56   : > { %s398_s9 = sadd.s32 1, %s3093_s23  ;;  %s394_s4 = sld [smem:[#allocation4 + %s4343_s19]] }
  0x57   : > { %s4202_s20 = scalar_select %p3428_p2, 1, 0 }
  0x58   : > { %p405_p8 = scmp.ne.s32.totalorder %s3093_s23, %s3089_s12  ;;  %p411_p12 = scmp.ne.s32.totalorder %s3089_s12, %s3085_s2 }
  0x59   : > { %s734_s15 = sand.u32 1, %s3093_s23   ;;  %p4204_p9 = scmp.eq.s32.totalorder %s3370_s14, 0 }
  0x5a   : > { %p3442_p13 = por %p405_p8, %p4119_p1  ;;  %s2332_s6 = sshll.u32 %s734_s15, 4 }
  0x5b   : > { %p3448_p10 = por %p411_p12, %p4204_p9  ;;  %s736_s7 = scalar_lea.vmem [#allocation11], %s2332_s6 }
  0x5c   : > { %s2543_s27 = scalar_select %p3442_p13, [#allocation4], [#allocation16] }
  0x5d   : > { %s4205_s22 = scalar_select %p3448_p10, 1, 0 }
  0x5e   : > { %s2544_s2 = scalar_select %p3442_p13, %s3141_s18, 0 }
  0x5f   : > { %4206 = sst [smem:[#allocation48_spill]] %s4205_s22  ;;  %s395_s5 = ssub.s32 %s393_s26, %s394_s4 }
  0x60   : > { %s744_s28 = sshll.u32 %s736_s7, 4  ;;  %p396_p11 = scmp.eq.s32.totalorder %s395_s5, 0  ;;  %s3457_s28 = int_to_ptr.vmem [resolvable:$true] %s744_s28 }
  0x61   : > { %p4207_p3 = scmp.lt.s32.totalorder %s3149_s16, 8  ;;  %s4212_s13 = sld [smem:[#allocation74_spill]] }
  0x62   : > { %s3462_s12 = scalar_select %p396_p11, %s3093_s23, %s398_s9  }
  0x63   : > { %s4345_s27 = smov (!%p4207_p3, %s2543_s27), [#allocation19]  ;;  %p4209_p4 = pmov %p4207_p3 }
  0x64   : > { %4208 = sst [smem:[#allocation49_spill]] %s3462_s12  ;;  %p4210_p5 = pmov %p4207_p3 }
  0x65   : > { %s4347_s2 = smov (!%p4209_p4, %s2544_s2), 0  ;;  %s4213_s6 = sand.u32 1, %s3149_s16  }
  0x66   : > { %p3470_p6 = pnand %p4210_p5, %p3442_p13  ;;  %s737_s22 = sld [smem:[%s4345_s27 + %s4347_s2]] }
  0x67   : > { %s3481_s9 = scalar_lea.sflag [#allocation12], %s4213_s6 }
  0x68   : > { %p2829_p12 = pneg %p3470_p6 }
  0x6c   : > { %s2396_s26 = sshll.u32 %s737_s22, 8  ;;  %s2832_s22 = scalar_lea.hbm %s4212_s13, 768 }
  0x6d   : > { %s3477_s5 = scalar_lea.hbm %s4212_s13, %s2396_s26 }
  0x6e   : > { %s2827_s21 = scalar_lea.hbm %s3477_s5, 256  ;;  %p2833_p11 = scmp.lt.s32.totalorder %s3477_s5, %s4212_s13 }
  0x6f   : > { %p2828_p8 = scmp.ne.s32.totalorder %s3477_s5, %s2827_s21  ;;  %p2834_p3 = scmp.lt.s32.totalorder %s2832_s22, %s2827_s21 }
  0x71   : > { %p2830_p13 = pnand %p2829_p12, %p2828_p8  ;;  %p2835_p4 = por %p2834_p3, %p2833_p11 }
  0x73   : > { %p2831_p9 = pneg %p2830_p13 }
  0x75   : > { %p2836_p5 = pnand %p2835_p4, %p2831_p9 }
  0x77   : > { %2839 = shalt.err (!%p2836_p5)
}
  0x78   : > { %s2840_s26 = scalar_lea.vmem %s3457_s28, 256  ;;  %s3153_s7 = smov [#allocation11]  }
  0x79   : > { %p2841_p1 = scmp.ne.s32.totalorder %s3457_s28, %s2840_s26  ;;  %s2845_s6 = sshll.u32 %s3153_s7, 4  ;;  %s2846_s6 = int_to_ptr.vmem [resolvable:$false] %s2845_s6 }
  0x7a   : > { %s2847_s12 = scalar_lea.vmem %s2846_s6, 512  ;;  %p2848_p13 = scmp.lt.s32.totalorder %s3457_s28, %s2846_s6 }
  0x7b   : > { %p2843_p10 = pnand %p2841_p1, %p2829_p12  ;;  %p2849_p7 = scmp.lt.s32.totalorder %s2847_s12, %s2840_s26 }
  0x7d   : > { %p2844_p8 = pneg %p2843_p10  ;;  %p2850_p2 = por %p2849_p7, %p2848_p13 }
  0x7f   : > { %p2851_p0 = pnand %p2850_p2, %p2844_p8 }
  0x81   : > { %2854 = shalt.err (!%p2851_p0)
}
  0x82   : > { %s4123_s21 = smov 64   ;;  %s4124_s27 = smov 4  }
  0x83   : > { %2572 = dma.hbm_to_vmem [thread:$0]  (!%p3470_p6), %s3477_s5, 256, %s3457_s28, %s3481_s9, %s4123_s21, %s4123_s21, %s4124_s27  }
  0x84   : > { %s2325_s22 = sadd.s32 4294967294, %s3149_s16   ;;  %s57_s2 = sadd.s32 1, %s3145_s17 }
  0x85   : > { %s64_s4 = sadd.s32 1, %s3129_s30  ;;  %p4214_p0 = scmp.ne.s32.totalorder %s4195_s11, 0 }
  0x86   : > { %p71_p1 = scmp.ne.s32.totalorder %s3129_s30, %s3125_s0  ;;  %p77_p7 = scmp.ne.s32.totalorder %s3125_s0, %s3121_s29 }
  0x87   : > { %s4349_s2 = smov (!%p4214_p0, %s57_s2), %s3145_s17  ;;  %p575_p10 = scmp.eq.s32.totalorder %s3370_s14, 7 }
  0x88   : > { %p59_p2 = scmp.ge.s32.totalorder %s4349_s2, 2  ;;  %p4215_p12 = scmp.eq.s32.totalorder %s3149_s16, 0 }
  0x89   : > { %p4217_p11 = scmp.eq.s32.totalorder %s3370_s14, 0  ;;  %p3530_p3 = por %p575_p10, %p71_p1 }
  0x8a   : > { %p3518_p9 = por %p4215_p12, %p71_p1  ;;  %s4351_s2 = smov (%p59_p2, %s4349_s2), 0 }
  0x8b   : > { %p3524_p6 = por %p4217_p11, %p77_p7  ;;  %4220 = sst [smem:[#allocation51_spill]] %s4351_s2 }
  0x8c   : > { %s4221_s11 = scalar_select %p3530_p3, 1, 0 }
  0x8d   : > { %s4218_s28 = scalar_select %p3524_p6, 1, 0 }
  0x8e   : > { %4222 = sst [smem:[#allocation52_spill]] %s4221_s11  ;;  %p581_p4 = scmp.eq.s32.totalorder %s2325_s22, 7 }
  0x8f   : > { %4219 = sst [smem:[#allocation50_spill]] %s4218_s28  ;;  %s61_s15 = ssub.s32 %s3145_s17, %s4351_s2 }
  0x90   : > { %s601_s5 = sand.u32 1, %s3129_s30   ;;  %p62_p5 = scmp.eq.s32.totalorder %s61_s15, 0 }
  0x91   : > { %p3537_p8 = por %p581_p4, %p77_p7  ;;  %s2328_s6 = sshll.u32 %s601_s5, 3 }
  0x92   : > { %s3542_s12 = scalar_select %p62_p5, %s3129_s30, %s64_s4  }
  0x93   : > { %s4223_s7 = scalar_select %p3537_p8, 1, 0 }
  0x94   : > { %4225 = sst [smem:[#allocation54_spill]] %s3542_s12  ;;  %s2329_s21 = sshll.u32 %s3145_s17, 7 }
  0x95   : > { %4224 = sst [smem:[#allocation53_spill]] %s4223_s7  ;;  %s605_s8 = scalar_lea.vmem [#allocation5], %s2328_s6 }
  0x96   : > { %s4226_s23 = sld [smem:[#allocation62_spill]]  ;;  %s612_s28 = sshll.u32 %s605_s8, 4  ;;  %s613_s28 = int_to_ptr.vmem [resolvable:$true] %s612_s28 }
  0x97   : > { %p4227_p13 = scmp.lt.s32.totalorder %s3149_s16, 8  ;;  %s602_s15 = scalar_lea.sflag [#allocation6], %s601_s5 }
  0x98   : > { %s2868_s4 = scalar_lea.vmem %s613_s28, 128  ;;  %s3156_s2 = smov [#allocation5]  }
  0x99   : > { %p3552_p0 = pnand %p4227_p13, %p3518_p9  ;;  %p2869_p7 = scmp.ne.s32.totalorder %s613_s28, %s2868_s4 }
  0x9a   : > { %s2873_s13 = sshll.u32 %s3156_s2, 4  ;;  %s2874_s13 = int_to_ptr.vmem [resolvable:$false] %s2873_s13 }
  0x9b   : > { %p2857_p1 = pneg %p3552_p0  ;;  %p2876_p12 = scmp.lt.s32.totalorder %s613_s28, %s2874_s13 }
  0x9c   : > { %s610_s29 = scalar_lea.hbm %s4226_s23, %s2329_s21  ;;  %s2875_s23 = scalar_lea.vmem %s2874_s13, 256 }
  0x9d   : > { %p2871_p2 = pnand %p2869_p7, %p2857_p1  ;;  %p2877_p11 = scmp.lt.s32.totalorder %s2875_s23, %s2868_s4 }
  0x9f   : > { %p2872_p10 = pneg %p2871_p2  ;;  %p2878_p4 = por %p2877_p11, %p2876_p12 }
  0xa1   : > { %p2879_p5 = pnand %p2878_p4, %p2872_p10 }
  0xa3   : > { %2882 = shalt.err (!%p2879_p5)
}
  0xa4   : > { %2559 = dma.hbm_to_vmem [thread:$0]  (!%p3552_p0), %s610_s29, 128, %s613_s28, %s602_s15  }
  0xa5   : > { %s197_s8 = sld [smem:[#allocation4 + %s3141_s18]]  ;;  %p209_p9 = scmp.ne.s32.totalorder %s3105_s3, %s3101_s25 }
  0xa6   : > { %s198_s21 = sld [smem:[#allocation4 + %s4343_s19]]  ;;  %p215_p13 = scmp.ne.s32.totalorder %s3101_s25, %s3097_s24 }
  0xa7   : > { %s202_s27 = sadd.s32 1, %s3105_s3  ;;  %s662_s2 = sand.u32 1, %s3105_s3  }
  0xa8   : > { %p4229_p1 = scmp.eq.s32.totalorder %s3149_s16, 0  ;;  %s4230_s26 = sld [smem:[#allocation30_spill]] }
  0xa9   : > { %p4231_p2 = scmp.eq.s32.totalorder %s3370_s14, 0  ;;  %s4232_s5 = sld [smem:[#allocation28_spill]] }
  0xaa   : > { %p211_p7 = por %p209_p9, %p4229_p1  ;;  %s663_s24 = scalar_lea.vmem [#allocation10], %s662_s2 }
  0xab   : > { %p3572_p10 = por %p215_p13, %p4231_p2  ;;  %s671_s22 = sshll.u32 %s663_s24, 4  ;;  %s3600_s22 = int_to_ptr.vmem [resolvable:$true] %s671_s22 }
  0xac   : > { %s2540_s28 = scalar_select %p211_p7, [#allocation4], [#allocation15] }
  0xad   : > { %s4233_s29 = scalar_select %p3572_p10, 1, 0 }
  0xae   : > { %s199_s6 = ssub.s32 %s197_s8, %s198_s21  ;;  %p4235_p12 = scmp.lt.s32.totalorder %s3149_s16, 8 }
  0xaf   : > { %p200_p0 = scmp.eq.s32.totalorder %s199_s6, 0  ;;  %s3591_s8 = sld [smem:[#allocation4 + %s3141_s18]] }
  0xb0   : > { %s2541_s15 = scalar_select %p211_p7, %s3141_s18, 0 }
  0xb1   : > { %s3578_s4 = scalar_select %p200_p0, %s3105_s3, %s202_s27  }
  0xb2   : > { %s4353_s28 = smov (!%p4235_p12, %s2540_s28), [#allocation18]  ;;  %p4236_p11 = pmov %p4235_p12 }
  0xb3   : > { %4234 = sst [smem:[#allocation55_spill]] %s3578_s4  ;;  %p461_p9 = scmp.ne.s32.totalorder %s4230_s26, %s3077_s1 }
  0xb4   : > { %s4355_s15 = smov (!%p4236_p11, %s2541_s15), 0  ;;  %p4237_p4 = pmov %p4236_p11 }
  0xb5   : > { %s664_s23 = sld [smem:[%s4353_s28 + %s4355_s15]]  ;;  %p467_p13 = scmp.ne.s32.totalorder %s3077_s1, %s4232_s5 }
  0xb6   : > { %p3586_p5 = pnand %p4237_p4, %p211_p7  ;;  %s3594_s21 = sld [smem:[#allocation4 + %s4343_s19]] }
  0xb7   : > { %p3605_p2 = por %p461_p9, %p4229_p1  ;;  %s4240_s12 = sld [smem:[#allocation67_spill]] }
  0xb8   : > { %p4242_p7 = scmp.eq.s32.totalorder %s3370_s14, 0  ;;  %p2885_p11 = pneg %p3586_p5 }
  0xb9   : > { %s4239_s6 = scalar_select %p3605_p2, 1, 0 }
  0xba   : > { %p3614_p0 = por %p467_p13, %p4242_p7 }
  0xbb   : > { %s2331_s2 = sshll.u32 %s664_s23, 4 }
  0xbc   : > { %s4243_s28 = scalar_select %p3614_p0, 1, 0 }
  0xbd   : > { %s4241_s4 = smov %s4240_s12  ;;  %s669_s30 = scalar_lea.hbm %s4240_s12, %s2331_s2 }
  0xbe   : > { %s2883_s15 = scalar_lea.hbm %s669_s30, 16  ;;  %s2888_s27 = scalar_lea.hbm %s4241_s4, 48 }
  0xbf   : > { %p2884_p12 = scmp.ne.s32.totalorder %s669_s30, %s2883_s15  ;;  %p2889_p9 = scmp.lt.s32.totalorder %s669_s30, %s4241_s4 }
  0xc0   : > { %p2890_p1 = scmp.lt.s32.totalorder %s2888_s27, %s2883_s15 }
  0xc1   : > { %p2886_p4 = pnand %p2885_p11, %p2884_p12 }
  0xc2   : > { %p2891_p3 = por %p2890_p1, %p2889_p9 }
  0xc3   : > { %p2887_p8 = pneg %p2886_p4 }
  0xc5   : > { %p2892_p13 = pnand %p2891_p3, %p2887_p8 }
  0xc7   : > { %2895 = shalt.err (!%p2892_p13)
}
  0xc8   : > { %s2896_s17 = scalar_lea.vmem %s3600_s22, 16  ;;  %s3157_s12 = smov [#allocation10]  }
  0xc9   : > { %p2897_p7 = scmp.ne.s32.totalorder %s3600_s22, %s2896_s17  ;;  %s2901_s2 = sshll.u32 %s3157_s12, 4  ;;  %s2902_s2 = int_to_ptr.vmem [resolvable:$false] %s2901_s2 }
  0xca   : > { %s2903_s24 = scalar_lea.vmem %s2902_s2, 32  ;;  %p2904_p4 = scmp.lt.s32.totalorder %s3600_s22, %s2902_s2 }
  0xcb   : > { %p2899_p0 = pnand %p2897_p7, %p2885_p11  ;;  %p2905_p10 = scmp.lt.s32.totalorder %s2903_s24, %s2896_s17 }
  0xcd   : > { %p2900_p12 = pneg %p2899_p0  ;;  %p2906_p6 = por %p2905_p10, %p2904_p4 }
  0xcf   : > { %p2907_p2 = pnand %p2906_p6, %p2900_p12 }
  0xd1   : > { %2910 = shalt.err (!%p2907_p2)
}
  0xd2   : > { %2567 = dma.hbm_to_vmem [thread:$0]  (!%p3586_p5), %s669_s30, 16, %s3600_s22, %s3417_s10  }
  0xd3   : > { %s451_s19 = ssub.s32 %s3591_s8, %s3594_s21  ;;  %s454_s3 = sadd.s32 1, %s4230_s26 }
  0xd4   : > { %p452_p6 = scmp.eq.s32.totalorder %s451_s19, 0  ;;  %s4244_s27 = sand.u32 1, %s4230_s26  }
  0xd5   : > { %s2335_s13 = sshll.u32 %s4244_s27, 4  ;;  %p4245_p3 = scmp.ne.s32.totalorder %s4239_s6, 0 }
  0xd6   : > { %s4357_s26 = smov (!%p452_p6, %s4230_s26), %s454_s3  ;;  %p4247_p8 = scmp.lt.s32.totalorder %s3149_s16, 8 }
  0xd7   : > { %s2546_s15 = scalar_select %p4245_p3, [#allocation4], [#allocation17] }
  0xd8   : > { %4246 = sst [smem:[#allocation56_spill]] %s4357_s26  ;;  %p4248_p10 = pmov %p4247_p8 }
  0xd9   : > { %s2547_s5 = scalar_select %p4245_p3, %s3141_s18, 0 }
  0xda   : > { %s4359_s15 = smov (!%p4247_p8, %s2546_s15), [#allocation20]  ;;  %p4249_p2 = pmov %p4247_p8 }
  0xdb   : > { %s4361_s5 = smov (!%p4248_p10, %s2547_s5), 0  ;;  %s766_s10 = scalar_lea.vmem [#allocation13], %s2335_s13 }
  0xdc   : > { %p3654_p0 = pnand %p4249_p2, %p4245_p3  ;;  %s767_s30 = sld [smem:[%s4359_s15 + %s4361_s5]] }
  0xdd   : > { %s774_s22 = sshll.u32 %s766_s10, 4  ;;  %s4251_s12 = sld [smem:[#allocation76_spill]]  ;;  %s3658_s22 = int_to_ptr.vmem [resolvable:$true] %s774_s22 }
  0xde   : > { %p2913_p11 = pneg %p3654_p0 }
  0xe2   : > { %s2397_s8 = sshll.u32 %s767_s30, 8 }
  0xe3   : > { %s4252_s4 = smov %s4251_s12  ;;  %s3663_s2 = scalar_lea.hbm %s4251_s12, %s2397_s8 }
  0xe4   : > { %s2911_s6 = scalar_lea.hbm %s3663_s2, 256  ;;  %s2916_s3 = scalar_lea.hbm %s4252_s4, 768 }
  0xe5   : > { %p2912_p5 = scmp.ne.s32.totalorder %s3663_s2, %s2911_s6  ;;  %p2917_p13 = scmp.lt.s32.totalorder %s3663_s2, %s4252_s4 }
  0xe6   : > { %p2918_p7 = scmp.lt.s32.totalorder %s2916_s3, %s2911_s6 }
  0xe7   : > { %p2914_p9 = pnand %p2913_p11, %p2912_p5 }
  0xe8   : > { %p2919_p12 = por %p2918_p7, %p2917_p13 }
  0xe9   : > { %p2915_p1 = pneg %p2914_p9 }
  0xeb   : > { %p2920_p4 = pnand %p2919_p12, %p2915_p1 }
  0xed   : > { %2923 = shalt.err (!%p2920_p4)
}
  0xee   : > { %s2924_s15 = scalar_lea.vmem %s3658_s22, 256  ;;  %s3158_s5 = smov [#allocation13]  }
  0xef   : > { %p2925_p6 = scmp.ne.s32.totalorder %s3658_s22, %s2924_s15  ;;  %s2929_s30 = sshll.u32 %s3158_s5, 4  ;;  %s2930_s30 = int_to_ptr.vmem [resolvable:$false] %s2929_s30 }
  0xf0   : > { %s2931_s10 = scalar_lea.vmem %s2930_s30, 512  ;;  %p2932_p10 = scmp.lt.s32.totalorder %s3658_s22, %s2930_s30 }
  0xf1   : > { %p2927_p3 = pnand %p2925_p6, %p2913_p11  ;;  %p2933_p2 = scmp.lt.s32.totalorder %s2931_s10, %s2924_s15 }
  0xf3   : > { %p2928_p8 = pneg %p2927_p3  ;;  %p2934_p5 = por %p2933_p2, %p2932_p10 }
  0xf5   : > { %p2935_p9 = pnand %p2934_p5, %p2928_p8 }
  0xf7   : > { %2938 = shalt.err (!%p2935_p9)
}
  0xf8   : > { %s4253_s8 = smov 4   ;;  %s4254_s21 = smov 64  }
  0xf9   : > { %2577 = dma.hbm_to_vmem [thread:$0]  (!%p3654_p0), %s3663_s2, 256, %s3658_s22, %s3481_s9, %s4254_s21, %s4254_s21, %s4253_s8  }
  0xfa   : > { %p4255_p11 = scmp.ne.s32.totalorder %s4202_s20, 0 }
  0xfc   : > { %812 = sbr.rel (%p4255_p11) target bundleno = 2798 (0xaee), region = 92 }
 0x101   : > { %s4256_s17 = sld [smem:[#allocation50_spill]]  ;;  %s3690_s12 = sand.u32 1, %s3125_s0  }
 0x102   : > { %s4142_s6 = sshll.u32 %s3690_s12, 3  ;;  %s815_s24 = scalar_lea.sflag [#allocation6], %s3690_s12 }
 0x103   : > { %s3696_s23 = scalar_lea.vmem [#allocation5], %s4142_s6 }
 0x107   : > { %p4257_p1 = scmp.ne.s32.totalorder %s4256_s17, 0 }
 0x109   : > { %3048 = dma.done.wait (%p4257_p1), %s815_s24, 128  }
 0x10a   : > { %3050 = vsyncadd (%p4257_p1), %s815_s24, 4294967168  ;;  %s4258_s20 = sld [smem:[#allocation35_spill]]  ;;  %s823_s22 = sand.u32 1, %s3370_s14  }
 0x10b   : > { %s4259_s9 = sld [smem:[#allocation46_spill]]  ;;  %s824_s19 = scalar_lea.sflag [#allocation9], %s823_s22 }
 0x110   : > { %s825_s2 = sand.u32 1, %s4258_s20  }
 0x111   : > { %s3704_s3 = scalar_lea.vmem [#allocation8], %s825_s2  ;;  %p4260_p0 = scmp.ne.s32.totalorder %s4259_s9, 0 }
 0x113   : > { %3052 = dma.done.wait (%p4260_p0), %s824_s19, 16  }
 0x114   : > { %3054 = vsyncadd (%p4260_p0), %s824_s19, 4294967280  ;;  %s833_s27 = sand.u32 1, %s3101_s25   ;;  %p4262_p13 = scmp.ne.s32.totalorder %s4233_s29, 0 }
 0x115   : > { %s3711_s13 = scalar_lea.vmem [#allocation10], %s833_s27 }
 0x116   : > { %4261 = sst [smem:[#allocation57_spill]] %s3711_s13 }
 0x117   : > { %3056 = dma.done.wait (%p4262_p13), %s824_s19, 16  }
 0x118   : > { %3058 = vsyncadd (%p4262_p13), %s824_s19, 4294967280  ;;  %s4263_s14 = sld [smem:[#allocation31_spill]]  ;;  %s840_s10 = scalar_lea.sflag [#allocation12], %s823_s22 }
 0x119   : > { %s4264_s15 = sld [smem:[#allocation48_spill]] }
 0x11e   : > { %s841_s5 = sand.u32 1, %s4263_s14  }
 0x11f   : > { %s3718_s30 = sshll.u32 %s841_s5, 4  ;;  %p4265_p7 = scmp.ne.s32.totalorder %s4264_s15, 0 }
 0x121   : > { %3060 = dma.done.wait (%p4265_p7), %s840_s10, 256  }
 0x122   : > { %3062 = vsyncadd (%p4265_p7), %s840_s10, 4294967040  ;;  %s850_s21 = sand.u32 1, %s3077_s1   ;;  %p4267_p12 = scmp.ne.s32.totalorder %s4243_s28, 0 }
 0x123   : > { %s3726_s17 = sshll.u32 %s850_s21, 4 }
 0x124   : > { %4266 = sst [smem:[#allocation58_spill]] %s3726_s17 }
 0x125   : > { %3064 = dma.done.wait (%p4267_p12), %s840_s10, 256  }
 0x126   : > { %3066 = vsyncadd (%p4267_p12), %s840_s10, 4294967040  ;;  %s4268_s24 = sld [smem:[#allocation40_spill]] }
 0x127   : > { %s4273_s21 = sld [smem:[#allocation68_spill]] }
 0x128   : > { %s4275_s1 = sld [smem:[#allocation70_spill]] }
 0x129   : > { %s4277_s11 = sld [smem:[#allocation72_spill]] }
 0x12a   : > { %s4283_s18 = sld [smem:[#allocation79_spill]] }
 0x12c   : > { %s983_s20 = sld [smem:[#allocation4 + %s4268_s24]]  ;;  %p2351_p12 = scmp.ne.s32.totalorder %s4268_s24, 0 }
 0x12d   : > { %s988_s9 = sld [smem:[#allocation4 + %s4268_s24]] }
 0x12e   : > { %s993_s22 = sld [smem:[#allocation4 + %s4268_s24]] }
 0x12f   : > { %s999_s2 = sld [smem:[#allocation4 + %s4268_s24]] }
 0x130   : > { %s1006_s19 = sld [smem:[#allocation4 + %s4268_s24]] }
 0x131   : > { %s1011_s27 = sld [smem:[#allocation4 + %s4268_s24]] }
 0x132   : > { %p984_p4 = scmp.lt.s32.totalorder %s983_s20, 2  ;;  %s1018_s14 = sld [smem:[#allocation4 + %s4268_s24]] }
 0x133   : > { %p989_p6 = scmp.lt.s32.totalorder %s988_s9, 2  ;;  %s1023_s15 = sld [smem:[#allocation4 + %s4268_s24]] }
 0x134   : > { %s4363_s20 = smov (!%p984_p4, %s983_s20), 2  ;;  %p994_p3 = scmp.lt.s32.totalorder %s993_s22, 2 }
 0x135   : > { %s4365_s9 = smov (!%p989_p6, %s988_s9), 2  ;;  %p1000_p8 = scmp.lt.s32.totalorder %s999_s2, 2 }
 0x136   : > { %s4367_s22 = smov (!%p994_p3, %s993_s22), 2  ;;  %p1007_p10 = scmp.lt.s32.totalorder %s1006_s19, 2 }
 0x137   : > { %4271 = sst [smem:[#allocation59_spill]] %s4367_s22  ;;  %s4369_s2 = smov (!%p1000_p8, %s999_s2), 2 }
 0x138   : > { %s2398_s28 = sshll.u32 %s4369_s2, 4  ;;  %p1012_p2 = scmp.lt.s32.totalorder %s1011_s27, 2 }
 0x139   : > { %s3762_s8 = scalar_lea.vmem %s4273_s21, %s2398_s28  ;;  %p1019_p5 = scmp.lt.s32.totalorder %s1018_s14, 2 }
 0x13a   : > { %s4371_s19 = smov (!%p1007_p10, %s1006_s19), 2  ;;  %s4373_s27 = smov (!%p1012_p2, %s1011_s27), 2 }
 0x13b   : > { %p1024_p9 = scmp.lt.s32.totalorder %s1023_s15, 2  ;;  %s2399_s25 = sshll.u32 %s4373_s27, 4 }
 0x13c   : > { %s1030_s0 = sld [smem:[#allocation4 + %s4268_s24]]  ;;  %s3774_s5 = scalar_lea.vmem %s4275_s1, %s2399_s25 }
 0x13d   : > { %s1036_s21 = sld [smem:[#allocation4 + %s4268_s24]]  ;;  %s4375_s14 = smov (!%p1019_p5, %s1018_s14), 2 }
 0x13e   : > { %s4377_s15 = smov (!%p1024_p9, %s1023_s15), 2  ;;  %s1042_s6 = sld [smem:[#allocation4 + %s4268_s24]] }
 0x13f   : > { %s2400_s29 = sshll.u32 %s4377_s15, 4  ;;  %s1047_s4 = sld [smem:[#allocation4 + %s4268_s24]] }
 0x140   : > { %s3788_s13 = scalar_lea.vmem %s4277_s11, %s2400_s29  ;;  %s1054_s1 = sld [smem:[#allocation4 + %s4268_s24]] }
 0x141   : > { %s4281_s27 = sld [smem:[#allocation77_spill]]  ;;  %s4284_s15 = sshll.u32 %s3690_s12, 3 }
 0x142   : > { %p1031_p11 = scmp.lt.s32.totalorder %s1030_s0, 2  ;;  %s4282_s25 = sld [smem:[#allocation78_spill]] }
 0x143   : > { %p1037_p1 = scmp.lt.s32.totalorder %s1036_s21, 2 }
 0x144   : > { %s4379_s0 = smov (!%p1031_p11, %s1030_s0), 2  ;;  %p1043_p0 = scmp.lt.s32.totalorder %s1042_s6, 2 }
 0x145   : > { %s4381_s21 = smov (!%p1037_p1, %s1036_s21), 2  ;;  %p1048_p13 = scmp.lt.s32.totalorder %s1047_s4, 2 }
 0x146   : > { %4278 = sst [smem:[#allocation60_spill]] %s4381_s21  ;;  %s4383_s6 = smov (!%p1043_p0, %s1042_s6), 2 }
 0x147   : > { %s4385_s4 = smov (!%p1048_p13, %s1047_s4), 2  ;;  %s1045_s16 = scalar_lea.vmem %s4281_s27, %s4383_s6 }
 0x148   : > { %p1055_p7 = scmp.lt.s32.totalorder %s1054_s1, 2  ;;  %s2401_s22 = sshll.u32 %s4385_s4, 5 }
 0x149   : > { %s3812_s7 = scalar_lea.vmem %s4282_s25, %s2401_s22  ;;  %s3822_s21 = scalar_lea.vmem [#allocation14], %s4284_s15 }
 0x14a   : > { %s4387_s1 = smov (!%p1055_p7, %s1054_s1), 2  ;;  %1063 = sbr.rel (%p2351_p12) target bundleno = 337 (0x151), region = 116 }
 0x14b   : > { %s1057_s11 = scalar_lea.vmem %s4283_s18, %s4387_s1 }
 0x14f   : > { %v1064_v0 = vld [vmem:[%s3696_s23] sm:$0xff]  ;;  %vm1065_vm0 = vcmask 261120  }
 0x150   : > { %1066 = vst.msk [vmem:[#allocation2] sm:$0xff] %vm1065_vm0, %v1064_v0 }
 0x151 PF: > { %v2352_v2 = vld [vmem:[%s3704_s3] ss:$0 sm:$0xff]  ;;  %vm1078_vm1 = vcmask 261120   ;;  %v2755_v10 = vld [vmem:[%s3762_s8 + $0x8] sm:$0xff]   ;;  %v3159_v12 = vmov 0.0   ;;  %vm3160_vm2 = vmmov 0  }
 0x152   : > { %v2756_v11 = vld [vmem:[%s3774_s5 + $0x8] sm:$0xff]   ;;  %2438 = vmatprep.subr.bf16.mxu0 %v3159_v12  ;;  %2446 = vmatprep.subr.bf16.mxu1 %v3159_v12  ;;  %v2757_v13 = vld [vmem:[%s3762_s8] sm:$0xff]   ;;  %s4285_s17 = sld [smem:[#allocation64_spill]]  ;;  %vm1304_vm3 = vcmask 64512   ;;  %s3161_s25 = smov 112   ;;  %vm1366_vm4 = vcmask 1043456  }
 0x153   : > { %2439 = vmatpush3.bf16.msra.mxu0 %v2755_v10  ;;  %2447 = vmatpush3.bf16.msra.mxu1 %v2756_v11  ;;  %v2758_v14 = vld [vmem:[%s3774_s5] sm:$0xff]   ;;  %s4287_s5 = sld [smem:[#allocation65_spill]]  ;;  %v2759_v24 = vld [vmem:[%s3788_s13 + $0x8] sm:$0xff]   ;;  %s4295_s23 = scalar_lea.vmem [#allocation11], %s3718_s30  ;;  %vm1756_vm5 = vcmask 130048   ;;  %vm1758_vm6 = vcmask 195584  }
 0x154   : > { %2440 = vmatprep.subr.bf16.mxu0 %v3159_v12  ;;  %2448 = vmatprep.subr.bf16.mxu1 %v3159_v12  ;;  %v2760_v26 = vld [vmem:[%s3788_s13] sm:$0xff]   ;;  %s4289_s15 = sld [smem:[#allocation69_spill]]  ;;  %s3164_s3 = smov 8   ;;  %vm1969_vm7 = vcmask 523264  }
 0x155   : > { %2442 = vmatprep.mubr.msk.bf16.mxu0 %vm3160_vm2, %v3159_v12  ;;  %2450 = vmatprep.mubr.msk.bf16.mxu1 %vm3160_vm2, %v3159_v12  ;;  %s4291_s27 = sld [smem:[#allocation71_spill]]  ;;  %s3166_s22 = smov 24  }
 0x156   : > { %s4293_s28 = sld [smem:[#allocation73_spill]] }
 0x157   : > { %v3826_v1 = vld [vmem:[#allocation2] sm:$0xff]  ;;  %2441 = vmatpush3.bf16.msra.mxu0 %v2757_v13  ;;  %2449 = vmatpush3.bf16.msra.mxu1 %v2758_v14  ;;  %s4297_s8 = sld [smem:[#allocation60_spill]] }
 0x158   : > { %v1075_v3 = vadd.f32 %v2352_v2, %v3826_v1  ;;  %2454 = vmatprep.subr.bf16.mxu0 %v3159_v12  ;;  %2462 = vmatprep.subr.bf16.mxu1 %v3159_v12  ;;  %s4286_s24 = scalar_lea.vmem %s4285_s17, %s4363_s20  ;;  %s3165_s17 = smov 16  }
 0x159   : > { %v2353_v19 = vld [vmem:[%s4286_s24] ss:$0 sm:$0xff]  ;;  %s4288_s4 = scalar_lea.vmem %s4287_s5, %s4365_s9  ;;  %s4296_s24 = smov %s4295_s23 }
 0x15a   : > { %v1079_v4 = vsel %vm1078_vm1, %v1075_v3, 0.0  ;;  %v2354_v21 = vld [vmem:[%s4288_s4] ss:$0 sm:$0xff]  ;;  %s4290_s13 = scalar_lea.vmem %s4289_s15, %s4371_s19  ;;  %s3162_s19 = smov 120  }
 0x15b   : > { %1080 = vadd.xlane.f32.xlu0 %v1079_v4  ;;  %v2355_v27 = vld [vmem:[%s4290_s13] ss:$0 sm:$0xff]  ;;  %s4292_s26 = scalar_lea.vmem %s4291_s27, %s4375_s14  ;;  %s4298_s4 = sld [smem:[#allocation75_spill]] }
 0x15c   : > { %v2359_v28 = vld [vmem:[%s4292_s26] ss:$0 sm:$0xff]  ;;  %s4294_s18 = scalar_lea.vmem %s4293_s28, %s4379_s0  ;;  %s3163_s0 = smov 104  }
 0x15d   : > { %v2363_v42 = vld [vmem:[%s4294_s18] ss:$0 sm:$0xff]  ;;  %s4300_s9 = sld [smem:[#allocation58_spill]] }
 0x15e   : > { %s4301_s15 = sld [smem:[#allocation59_spill]] }
 0x15f   : > { %s4302_s13 = sld [smem:[#allocation57_spill]] }
 0x161   : > { %s4299_s20 = scalar_lea.vmem %s4298_s4, %s4297_s8 }
 0x163   : > { %s4303_s10 = scalar_lea.vmem [#allocation13], %s4300_s9 }
 0x164   : > { %s4304_s29 = smov %s4303_s10 }
 0x1e4   : > { %v1081_v5 = vpop.xlane.xlu0 %1080 }
 0x1e5   : > { %v1083_v6 = vmul.f32 0.03125, %v1081_v5 }
 0x1e7   : > { %v1084_v7 = vsub.f32 %v1075_v3, %v1083_v6 }
 0x1e9   : > { %v1085_v8 = vmul.f32 %v1084_v7, %v1084_v7 }
 0x1eb   : > { %v1086_v9 = vsel %vm1078_vm1, %v1085_v8, 0.0 }
 0x1ec   : > { %1087 = vadd.xlane.f32.xlu0 %v1086_v9 }
 0x275   : > { %v1088_v15 = vpop.xlane.xlu0 %1087 }
 0x276   : > { %v1089_v16 = vmul.f32 0.03125, %v1088_v15 }
 0x278   : > { %v1090_v17 = vadd.f32 1e-12, %v1089_v16 }
 0x27a   : > { %2769 = vrsqrt.f32 %v1090_v17 }
 0x287   : > { %v2770_v18 = vpop.eup %2769 }
 0x288   : > { %v1092_v20 = vmul.f32 %v2770_v18, %v1084_v7 }
 0x28a   : > { %v1099_v22 = vmul.f32 %v2353_v19, %v1092_v20 }
 0x28c   : > { %v1106_v23 = vadd.f32 %v2354_v21, %v1099_v22 }
 0x28e   : > { %v1107_v25 = vpack.c.bf16 %v1106_v23, %v1106_v23 }
 0x290   : > { %2443 = vmatmul.mubr.msk.bf16.vlgmr.msra.gmra.mxu0 %vm1078_vm1, %v1107_v25  ;;  %2451 = vmatmul.mubr.msk.bf16.vlgmr.msra.gmra.mxu1 %vm1078_vm1, %v1107_v25 }
 0x291   : > { %2455 = vmatpush3.bf16.msra.mxu0 %v2759_v24  ;;  %2458 = vmatprep.mubr.msk.bf16.mxu0 %vm3160_vm2, %v3159_v12 }
 0x292   : > { %2456 = vmatprep.subr.bf16.mxu0 %v3159_v12  ;;  %2464 = vmatprep.mubr.msk.bf16.mxu1 %vm3160_vm2, %v3159_v12 }
 0x295   : > { %2457 = vmatpush3.bf16.msra.mxu0 %v2760_v26 }
 0x296   : > { %2468 = vmatprep.subr.bf16.mxu0 %v3159_v12 }
 0x298   : > { %2459 = vmatmul.mubr.msk.bf16.vlgmr.msra.gmra.mxu0 %vm1078_vm1, %v1107_v25 }
 0x299   : > { %2470 = vmatprep.mubr.msk.bf16.mxu0 %vm3160_vm2, %v3159_v12 }
 0x350   : > { %v1168_v29 = vpop.f32.mrf.mxu0  ;;  %v1231_v30 = vpop.f32.mrf.mxu1 }
 0x351   : > { %v1169_v31 = vadd.f32 %v2355_v27, %v1168_v29  ;;  %v1232_v32 = vadd.f32 %v2359_v28, %v1231_v30 }
 0x352   : > { %v2444_v33 = vpop.f32.mrf.mxu0  ;;  %v2452_v34 = vpop.f32.mrf.mxu1 }
 0x353   : > { %v1300_v35 = vmul.f32 0.35355338, %v1169_v31  ;;  %v1302_v36 = vpack.c.bf16 %v1232_v32, %v1232_v32 }
 0x354   : > { %v1171_v37 = vpop.f32.mrf.mxu0  ;;  %v1234_v38 = vpop.f32.mrf.mxu1 }
 0x355   : > { %1525 = vrot.lane.b32.xlu0 %v1302_v36, %s3161_s25  ;;  %1414 = vrot.lane.b32.xlu1 %v1302_v36, %s3162_s19  ;;  %v1309_v39 = vsel %vm1304_vm3, %v1302_v36, 0  ;;  %v1301_v43 = vpack.c.bf16 %v1300_v35, %v1300_v35 }
 0x356   : > { %v2445_v40 = vpop.f32.mrf.mxu0  ;;  %v2453_v41 = vpop.f32.mrf.mxu1  ;;  %2463 = vmatpush3.bf16.xpose.msra.mxu1 %v1309_v39 }
 0x357   : > { %2474 = vmatprep.subr.bf16.mxu1 %v3159_v12 }
 0x358   : > { %v1294_v44 = vpop.f32.mrf.mxu0 }
 0x359   : > { %v1295_v45 = vadd.f32 %v2363_v42, %v1294_v44  ;;  %1411 = vrot.lane.b32.xlu1 %v1301_v43, %s3162_s19 }
 0x35a   : > { %v2460_v46 = vpop.f32.mrf.mxu0 }
 0x35b   : > { %v3889_v47 = vpack.c.bf16 %v1295_v45, %v1295_v45 }
 0x35c   : > { %v1297_v48 = vpop.f32.mrf.mxu0 }
 0x35d   : > { %1523 = vrot.lane.b32.xlu1 %v1301_v43, %s3161_s25  ;;  %2465 = vmatmul.mubr.msk.bf16.vlgmr.msra.gmra.mxu1 %vm1304_vm3, %v1301_v43  ;;  %v1368_v49 = vsel %vm1366_vm4, %v3889_v47, 0 }
 0x35e   : > { %v2461_v50 = vpop.f32.mrf.mxu0  ;;  %2469 = vmatpush3.bf16.msra.mxu0 %v1368_v49  ;;  %2476 = vmatprep.mubr.msk.bf16.mxu1 %vm3160_vm2, %v3159_v12 }
 0x35f   : > { %2480 = vmatprep.subr.bf16.mxu0 %v3159_v12 }
 0x361   : > { %1635 = vrot.lane.b32.xlu1 %v1302_v36, %s3163_s0 }
 0x365   : > { %1633 = vrot.lane.b32.xlu1 %v1301_v43, %s3163_s0 }
 0x3c7   : > { %v1415_v51 = vpop.permute.xlu1 %1414  ;;  %v1526_v54 = vpop.permute.xlu0 %1525 }
 0x3c8   : > { %v1420_v52 = vsel %vm1304_vm3, %v1415_v51, 0  ;;  %v1531_v56 = vsel %vm1304_vm3, %v1526_v54, 0 }
 0x3c9   : > { %2475 = vmatpush3.bf16.xpose.msra.mxu1 %v1420_v52 }
 0x3ca   : > { %2486 = vmatprep.subr.bf16.mxu1 %v3159_v12 }
 0x3cb   : > { %v1412_v53 = vpop.permute.xlu1 %1411 }
 0x3cf   : > { %v1524_v55 = vpop.permute.xlu1 %1523 }
 0x3d0   : > { %2477 = vmatmul.mubr.msk.bf16.vlgmr.msra.gmra.mxu1 %vm1304_vm3, %v1412_v53 }
 0x3d1   : > { %2487 = vmatpush3.bf16.xpose.msra.mxu1 %v1531_v56  ;;  %2488 = vmatprep.mubr.msk.bf16.mxu1 %vm3160_vm2, %v3159_v12 }
 0x3d2   : > { %2498 = vmatprep.subr.bf16.mxu1 %v3159_v12 }
 0x3d3   : > { %v1636_v57 = vpop.permute.xlu1 %1635 }
 0x3d4   : > { %v1641_v58 = vsel %vm1304_vm3, %v1636_v57, 0 }
 0x3d7   : > { %v1634_v59 = vpop.permute.xlu1 %1633 }
 0x3d8   : > { %2489 = vmatmul.mubr.msk.bf16.vlgmr.msra.gmra.mxu1 %vm1304_vm3, %v1524_v55 }
 0x3d9   : > { %2499 = vmatpush3.bf16.xpose.msra.mxu1 %v1641_v58  ;;  %2500 = vmatprep.mubr.msk.bf16.mxu1 %vm3160_vm2, %v3159_v12 }
 0x3da   : > { %2510 = vmatprep.subr.bf16.mxu1 %v3159_v12 }
 0x3e0   : > { %2501 = vmatmul.mubr.msk.bf16.vlgmr.msra.gmra.mxu1 %vm1304_vm3, %v1634_v59 }
 0x3e1   : > { %2514 = vmatprep.mubr.msk.bf16.mxu1 %vm3160_vm2, %v3159_v12 }
 0x41d   : > { %v1345_v60 = vpop.f32.mrf.mxu1 }
 0x41e   : > { %v1351_v61 = vsel %vm1304_vm3, %v1345_v60, -inf }
 0x41f   : > { %1352 = vmax.xlane.f32.xlu1 %v1351_v61  ;;  %v2466_v62 = vpop.f32.mrf.mxu1 }
 0x421   : > { %v1348_v63 = vpop.f32.mrf.mxu1 }
 0x423   : > { %v2467_v0 = vpop.f32.mrf.mxu1 }
 0x424   : > { %v2761_v0 = vld [vmem:[%s4295_s23 + $0x8] sm:$0xff]  }
 0x425   : > { %2511 = vmatpush3.bf16.msra.mxu1 %v2761_v0 }
 0x426   : > { %2512 = vmatprep.subr.bf16.mxu1 %v3159_v12 }
 0x490   : > { %v1456_v2 = vpop.f32.mrf.mxu1 }
 0x491   : > { %v1462_v3 = vsel %vm1304_vm3, %v1456_v2, -inf }
 0x492   : > { %1463 = vmax.xlane.f32.xlu0 %v1462_v3  ;;  %v2478_v4 = vpop.f32.mrf.mxu1 }
 0x494   : > { %v1459_v5 = vpop.f32.mrf.mxu1 }
 0x496   : > { %v2479_v6 = vpop.f32.mrf.mxu1 }
 0x498   : > { %v1567_v7 = vpop.f32.mrf.mxu1 }
 0x499   : > { %v1573_v8 = vsel %vm1304_vm3, %v1567_v7, -inf }
 0x49a   : > { %1574 = vmax.xlane.f32.xlu1 %v1573_v8  ;;  %v2490_v9 = vpop.f32.mrf.mxu1 }
 0x49c   : > { %v1570_v10 = vpop.f32.mrf.mxu1 }
 0x49d   : > { %v2762_v10 = vld [vmem:[%s4296_s24] sm:$0xff]  }
 0x49e   : > { %v2491_v11 = vpop.f32.mrf.mxu1  ;;  %2513 = vmatpush3.bf16.msra.mxu1 %v2762_v10 }
 0x49f   : > { %2526 = vmatprep.subr.bf16.mxu1 %v3159_v12 }
 0x4a0   : > { %v1677_v13 = vpop.f32.mrf.mxu1 }
 0x4a1   : > { %v1683_v14 = vsel %vm1304_vm3, %v1677_v13, -inf }
 0x4a2   : > { %1684 = vmax.xlane.f32.xlu1 %v1683_v14  ;;  %v2502_v15 = vpop.f32.mrf.mxu1 }
 0x4a4   : > { %v1680_v16 = vpop.f32.mrf.mxu1 }
 0x4a6   : > { %v2503_v17 = vpop.f32.mrf.mxu1 }
 0x4a8   : > { %v1353_v18 = vpop.xlane.xlu1 %1352 }
 0x4a9   : > { %v1354_v19 = vsub.f32 %v1345_v60, %v1353_v18 }
 0x4ab   : > { %v1355_v20 = vmul.f32 1.442695, %v1354_v19 }
 0x4ad   : > { %2771 = vpow2.f32 %v1355_v20 }
 0x4ba   : > { %v2772_v21 = vpop.eup %2771 }
 0x4bb   : > { %v1357_v22 = vsel %vm1304_vm3, %v2772_v21, 0.0 }
 0x4bc   : > { %1358 = vadd.xlane.f32.xlu0 %v1357_v22 }
 0x51b   : > { %v1464_v23 = vpop.xlane.xlu0 %1463 }
 0x51c   : > { %v1465_v24 = vsub.f32 %v1456_v2, %v1464_v23  ;;  %v2375_v23 = vld [vmem:[%s4299_s20] ss:$0 sm:$0xff] }
 0x51e   : > { %v1466_v25 = vmul.f32 1.442695, %v1465_v24 }
 0x520   : > { %2773 = vpow2.f32 %v1466_v25 }
 0x523   : > { %v1575_v26 = vpop.xlane.xlu1 %1574 }
 0x524   : > { %v1576_v27 = vsub.f32 %v1567_v7, %v1575_v26 }
 0x526   : > { %v1577_v28 = vmul.f32 1.442695, %v1576_v27 }
 0x528   : > { %2775 = vpow2.f32 %v1577_v28 }
 0x52b   : > { %v1685_v34 = vpop.xlane.xlu1 %1684 }
 0x52c   : > { %v1686_v35 = vsub.f32 %v1677_v13, %v1685_v34 }
 0x52d   : > { %v2774_v29 = vpop.eup %2773 }
 0x52e   : > { %v1468_v30 = vsel %vm1304_vm3, %v2774_v29, 0.0  ;;  %v1687_v36 = vmul.f32 1.442695, %v1686_v35 }
 0x52f   : > { %1469 = vadd.xlane.f32.xlu1 %v1468_v30 }
 0x535   : > { %v2776_v31 = vpop.eup %2775 }
 0x536   : > { %v1579_v32 = vsel %vm1304_vm3, %v2776_v31, 0.0 }
 0x537   : > { %1580 = vadd.xlane.f32.xlu0 %v1579_v32 }
 0x540   : > { %1585 = vrot.lane.b32.xlu1 %v3889_v47, %s3161_s25  ;;  %s4305_s25 = sld [smem:[#allocation66_spill]] }
 0x545   : > { %v1359_v33 = vpop.xlane.xlu0 %1358 }
 0x546   : > { %2777 = vrcp.f32 %v1359_v33 }
 0x547   : > { %2779 = vpow2.f32 %v1687_v36  ;;  %v2763_v36 = vld [vmem:[%s4303_s10 + $0x8] sm:$0xff]  }
 0x54d   : > { %1475 = vrot.lane.b32.xlu0 %v3889_v47, %s3162_s19  ;;  %s4306_s19 = scalar_lea.vmem %s4305_s25, %s4301_s15 }
 0x553   : > { %v2778_v37 = vpop.eup %2777 }
 0x554   : > { %v1361_v38 = vmul.f32 %v2778_v37, %v2772_v21  ;;  %v2780_v40 = vpop.eup %2779 }
 0x555   : > { %v1689_v41 = vsel %vm1304_vm3, %v2780_v40, 0.0 }
 0x556   : > { %v1362_v39 = vpack.c.bf16 %v1361_v38, %v1361_v38 }
 0x558   : > { %2471 = vmatmul.mubr.msk.bf16.vlgmr.msra.gmra.mxu0 %vm1304_vm3, %v1362_v39 }
 0x559   : > { %2482 = vmatprep.mubr.msk.bf16.mxu0 %vm3160_vm2, %v3159_v12 }
 0x564   : > { %1690 = vadd.xlane.f32.xlu1 %v1689_v41  ;;  %v2379_v41 = vld [vmem:[%s4306_s19] ss:$0 sm:$0xff] }
 0x575   : > { %1695 = vrot.lane.b32.xlu1 %v3889_v47, %s3163_s0 }
 0x5b8   : > { %v1470_v42 = vpop.xlane.xlu1 %1469 }
 0x5b9   : > { %2781 = vrcp.f32 %v1470_v42 }
 0x5bc   : > { %v1586_v49 = vpop.permute.xlu1 %1585 }
 0x5bd   : > { %v1591_v51 = vsel %vm1366_vm4, %v1586_v49, 0  ;;  %v2766_v49 = vld [vmem:[%s3812_s7 + $0x10] sm:$0xff]  }
 0x5c0   : > { %v1581_v43 = vpop.xlane.xlu0 %1580 }
 0x5c1   : > { %2783 = vrcp.f32 %v1581_v43  ;;  %v2380_v43 = vld [vmem:[%s4302_s13] ss:$0 sm:$0xff] }
 0x5c4   : > { %v1476_v44 = vpop.permute.xlu0 %1475 }
 0x5c5   : > { %v1481_v45 = vsel %vm1366_vm4, %v1476_v44, 0 }
 0x5c6   : > { %v2782_v46 = vpop.eup %2781  ;;  %2481 = vmatpush3.bf16.msra.mxu0 %v1481_v45 }
 0x5c7   : > { %2492 = vmatprep.subr.bf16.mxu0 %v3159_v12  ;;  %v1472_v48 = vmul.f32 %v2782_v46, %v2774_v29 }
 0x5c9   : > { %v1473_v50 = vpack.c.bf16 %v1472_v48, %v1472_v48  ;;  %v2765_v48 = vld [vmem:[%s3812_s7 + $0x18] sm:$0xff]  }
 0x5cb   : > { %2483 = vmatmul.mubr.msk.bf16.vlgmr.msra.gmra.mxu0 %vm1304_vm3, %v1473_v50  ;;  %v2767_v50 = vld [vmem:[%s3812_s7 + $0x8] sm:$0xff]  }
 0x5cc   : > { %2493 = vmatpush3.bf16.msra.mxu0 %v1591_v51  ;;  %2494 = vmatprep.mubr.msk.bf16.mxu0 %vm3160_vm2, %v3159_v12  ;;  %v2768_v51 = vld [vmem:[%s3812_s7] sm:$0xff]  }
 0x5cd   : > { %2504 = vmatprep.subr.bf16.mxu0 %v3159_v12 }
 0x5ce   : > { %v2784_v47 = vpop.eup %2783 }
 0x5cf   : > { %v1583_v52 = vmul.f32 %v2784_v47, %v2776_v31  ;;  %v2381_v47 = vld [vmem:[%s1045_s16] ss:$0 sm:$0xff]  ;;  %s4309_s16 = sld [smem:[#allocation40_spill]] }
 0x5d1   : > { %v1584_v53 = vpack.c.bf16 %v1583_v52, %v1583_v52 }
 0x5d3   : > { %2495 = vmatmul.mubr.msk.bf16.vlgmr.msra.gmra.mxu0 %vm1304_vm3, %v1584_v53 }
 0x5d4   : > { %2506 = vmatprep.mubr.msk.bf16.mxu0 %vm3160_vm2, %v3159_v12 }
 0x5d5   : > { %p2391_p4 = scmp.ne.s32.totalorder %s4309_s16, 3 }
 0x5ed   : > { %v1691_v54 = vpop.xlane.xlu1 %1690 }
 0x5ee   : > { %2785 = vrcp.f32 %v1691_v54 }
 0x5f1   : > { %v1696_v55 = vpop.permute.xlu1 %1695 }
 0x5f2   : > { %v1701_v56 = vsel %vm1366_vm4, %v1696_v55, 0 }
 0x5f3   : > { %2505 = vmatpush3.bf16.msra.mxu0 %v1701_v56 }
 0x5f4   : > { %2518 = vmatprep.subr.bf16.mxu0 %v3159_v12 }
 0x5fb   : > { %v2786_v57 = vpop.eup %2785 }
 0x5fc   : > { %v1693_v58 = vmul.f32 %v2786_v57, %v2780_v40 }
 0x5fe   : > { %v1694_v59 = vpack.c.bf16 %v1693_v58, %v1693_v58 }
 0x600   : > { %2507 = vmatmul.mubr.msk.bf16.vlgmr.msra.gmra.mxu0 %vm1304_vm3, %v1694_v59 }
 0x601   : > { %2522 = vmatprep.mubr.msk.bf16.mxu0 %vm3160_vm2, %v3159_v12  ;;  %2519 = vmatpush3.bf16.msra.mxu0 %v2763_v36 }
 0x602   : > { %2520 = vmatprep.subr.bf16.mxu0 %v3159_v12 }
 0x618   : > { %v1404_v60 = vpop.f32.mrf.mxu0 }
 0x61a   : > { %v2472_v61 = vpop.f32.mrf.mxu0 }
 0x61c   : > { %v1407_v62 = vpop.f32.mrf.mxu0 }
 0x61d   : > { %v2385_v62 = vld [vmem:[%s1057_s11] ss:$0 sm:$0xff] }
 0x61e   : > { %v2473_v63 = vpop.f32.mrf.mxu0 }
 0x68b   : > { %v1517_v2 = vpop.f32.mrf.mxu0 }
 0x68c   : > { %1744 = vrot.lane.b32.xlu0 %v1517_v2, %s3164_s3 }
 0x68d   : > { %v2484_v3 = vpop.f32.mrf.mxu0 }
 0x68f   : > { %v1520_v4 = vpop.f32.mrf.mxu0 }
 0x691   : > { %v2485_v5 = vpop.f32.mrf.mxu0 }
 0x693   : > { %v1627_v6 = vpop.f32.mrf.mxu0 }
 0x694   : > { %1748 = vrot.lane.b32.xlu1 %v1627_v6, %s3165_s17 }
 0x695   : > { %v2496_v7 = vpop.f32.mrf.mxu0 }
 0x697   : > { %v1630_v8 = vpop.f32.mrf.mxu0 }
 0x699   : > { %v2497_v9 = vpop.f32.mrf.mxu0 }
 0x6c0   : > { %v1737_v11 = vpop.f32.mrf.mxu0 }
 0x6c1   : > { %1752 = vrot.lane.b32.xlu0 %v1737_v11, %s3166_s22 }
 0x6c2   : > { %v2508_v13 = vpop.f32.mrf.mxu0 }
 0x6c4   : > { %v1740_v14 = vpop.f32.mrf.mxu0 }
 0x6c6   : > { %v2509_v15 = vpop.f32.mrf.mxu0 }
 0x6fe   : > { %v1745_v16 = vpop.permute.xlu0 %1744 }
 0x6ff   : > { %v1755_v18 = vsel %vm1304_vm3, %v1404_v60, %v1745_v16 }
 0x706   : > { %v1749_v17 = vpop.permute.xlu1 %1748 }
 0x707   : > { %v1757_v19 = vsel %vm1756_vm5, %v1755_v18, %v1749_v17 }
 0x733   : > { %v1753_v20 = vpop.permute.xlu0 %1752 }
 0x734   : > { %v1759_v21 = vsel %vm1758_vm6, %v1757_v19, %v1753_v20 }
 0x735   : > { %v1760_v22 = vpack.c.bf16 %v1759_v21, %v1759_v21 }
 0x737   : > { %2515 = vmatmul.mubr.msk.bf16.vlgmr.msra.gmra.mxu1 %vm1078_vm1, %v1760_v22 }
 0x738   : > { %2534 = vmatprep.mubr.msk.bf16.mxu1 %vm3160_vm2, %v3159_v12  ;;  %2527 = vmatpush3.bf16.msra.mxu1 %v2765_v48 }
 0x739   : > { %2528 = vmatprep.subr.bf16.mxu1 %v3159_v12 }
 0x73c   : > { %2529 = vmatpush3.bf16.msra.mxu1 %v2766_v49 }
 0x73d   : > { %2530 = vmatprep.subr.bf16.mxu1 %v3159_v12 }
 0x740   : > { %2531 = vmatpush3.bf16.msra.mxu1 %v2767_v50 }
 0x741   : > { %2532 = vmatprep.subr.bf16.mxu1 %v3159_v12 }
 0x744   : > { %2533 = vmatpush3.bf16.msra.mxu1 %v2768_v51 }
 0x7f7   : > { %v1821_v24 = vpop.f32.mrf.mxu1 }
 0x7f8   : > { %v1822_v25 = vadd.f32 %v2375_v23, %v1821_v24 }
 0x7f9   : > { %v2516_v26 = vpop.f32.mrf.mxu1 }
 0x7fa   : > { %v1827_v27 = vadd.f32 %v1822_v25, %v3826_v1  ;;  %v2764_v1 = vld [vmem:[%s4304_s29] sm:$0xff]  }
 0x7fb   : > { %v1824_v28 = vpop.f32.mrf.mxu1  ;;  %2521 = vmatpush3.bf16.msra.mxu0 %v2764_v1 }
 0x7fc   : > { %v1830_v29 = vsel %vm1078_vm1, %v1827_v27, 0.0 }
 0x7fd   : > { %1831 = vadd.xlane.f32.xlu1 %v1830_v29  ;;  %v2517_v30 = vpop.f32.mrf.mxu1 }
 0x886   : > { %v1832_v31 = vpop.xlane.xlu1 %1831 }
 0x887   : > { %v1833_v32 = vmul.f32 0.03125, %v1832_v31 }
 0x889   : > { %v1834_v33 = vsub.f32 %v1827_v27, %v1833_v32 }
 0x88b   : > { %v1835_v34 = vmul.f32 %v1834_v33, %v1834_v33 }
 0x88d   : > { %v1836_v35 = vsel %vm1078_vm1, %v1835_v34, 0.0 }
 0x88e   : > { %1837 = vadd.xlane.f32.xlu0 %v1836_v35 }
 0x917   : > { %v1838_v37 = vpop.xlane.xlu0 %1837 }
 0x918   : > { %v1839_v38 = vmul.f32 0.03125, %v1838_v37 }
 0x91a   : > { %v1840_v39 = vadd.f32 1e-12, %v1839_v38 }
 0x91c   : > { %2787 = vrsqrt.f32 %v1840_v39 }
 0x929   : > { %v2788_v40 = vpop.eup %2787 }
 0x92a   : > { %v1842_v42 = vmul.f32 %v2788_v40, %v1834_v33 }
 0x92c   : > { %v1849_v44 = vmul.f32 %v2379_v41, %v1842_v42 }
 0x92e   : > { %v1856_v45 = vadd.f32 %v2380_v43, %v1849_v44 }
 0x930   : > { %v1857_v46 = vpack.c.bf16 %v1856_v45, %v1856_v45 }
 0x932   : > { %2523 = vmatmul.mubr.msk.bf16.vlgmr.msra.gmra.mxu0 %vm1078_vm1, %v1857_v46 }
 0x9f2   : > { %v1918_v52 = vpop.f32.mrf.mxu0 }
 0x9f3   : > { %v1919_v53 = vadd.f32 %v2381_v47, %v1918_v52 }
 0x9f4   : > { %v2524_v54 = vpop.f32.mrf.mxu0 }
 0x9f5   : > { %v1925_v55 = vmul.f32 0.70710677, %v1919_v53  ;;  %v1924_v59 = vmul.f32 0.5, %v1919_v53 }
 0x9f6   : > { %v1921_v56 = vpop.f32.mrf.mxu0 }
 0x9f7   : > { %2789 = verf.f32 %v1925_v55 }
 0x9f8   : > { %v2525_v57 = vpop.f32.mrf.mxu0 }
 0xa04   : > { %v2790_v58 = vpop.eup %2789 }
 0xa05   : > { %v1927_v60 = vadd.f32 1.0, %v2790_v58 }
 0xa07   : > { %v1928_v61 = vmul.f32 %v1927_v60, %v1924_v59 }
 0xa09   : > { %v1929_v12 = vpack.c.bf16 %v1928_v61, %v1928_v61 }
 0xa0b   : > { %2535 = vmatmul.mubr.msk.bf16.vlgmr.msra.gmra.mxu1 %vm1969_vm7, %v1929_v12 }
 0xacb   : > { %v2007_v63 = vpop.f32.mrf.mxu1 }
 0xacc   : > { %v2008_v0 = vadd.f32 %v2385_v62, %v2007_v63 }
 0xacd   : > { %v2536_v2 = vpop.f32.mrf.mxu1  ;;  %2018 = sbr.rel (%p2391_p4) target bundleno = 2771 (0xad3), region = 120 }
 0xace   : > { %v2013_v3 = vadd.f32 %v2008_v0, %v1827_v27 }
 0xacf   : > { %v2010_v4 = vpop.f32.mrf.mxu1 }
 0xad0   : > { %2014 = vst.msk [vmem:[#allocation2] sm:$0xff] %vm1078_vm1, %v2013_v3 }
 0xad1   : > { %v2537_v5 = vpop.f32.mrf.mxu1 }
 0xad2   : > { %2019 = vst.msk [vmem:[%s3822_s21] sm:$0xff] %vm1078_vm1, %v2013_v3 }
 0xad3 PF: > { %s4310_s6 = sld [smem:[#allocation41_spill]]  ;;  %s2034_s22 = sshll.u32 %s3822_s21, 4  ;;  %s2035_s22 = int_to_ptr.vmem [resolvable:$true] %s2034_s22 }
 0xad4   : > { %s4311_s1 = sld [smem:[#allocation52_spill]]  ;;  %s2021_s30 = scalar_lea.sflag [#allocation7], %s3690_s12 }
 0xad5   : > { %s4312_s17 = sld [smem:[#allocation80_spill]]  ;;  %s2939_s5 = scalar_lea.vmem %s2035_s22, 128 }
 0xad6   : > { %p2940_p6 = scmp.ne.s32.totalorder %s2035_s22, %s2939_s5  ;;  %s3167_s4 = smov [#allocation14]  }
 0xad7   : > { %s2943_s20 = sshll.u32 %s3167_s4, 4  ;;  %s2944_s20 = int_to_ptr.vmem [resolvable:$false] %s2943_s20 }
 0xad8   : > { %s2945_s9 = scalar_lea.vmem %s2944_s20, 256  ;;  %p2946_p2 = scmp.lt.s32.totalorder %s2035_s22, %s2944_s20 }
 0xad9   : > { %s2393_s11 = sshll.u32 %s4310_s6, 7  ;;  %p2947_p5 = scmp.lt.s32.totalorder %s2945_s9, %s2939_s5 }
 0xada   : > { %p4314_p3 = scmp.ne.s32.totalorder %s4311_s1, 0 }
 0xadb   : > { %s4313_s8 = smov %s4312_s17  ;;  %s2032_s24 = scalar_lea.hbm %s4312_s17, %s2393_s11 }
 0xadc   : > { %p2941_p8 = pnand %p2940_p6, %p4314_p3  ;;  %p2948_p9 = por %p2947_p5, %p2946_p2 }
 0xade   : > { %p2942_p10 = pneg %p2941_p8 }
 0xae0   : > { %p2949_p11 = pnand %p2948_p9, %p2942_p10 }
 0xae2   : > { %2952 = shalt.err (!%p2949_p11)
}
 0xae3   : > { %s2953_s15 = scalar_lea.hbm %s2032_s24, 128  ;;  %s2957_s13 = scalar_lea.hbm %s4313_s8, 256 }
 0xae4   : > { %p2954_p1 = scmp.ne.s32.totalorder %s2032_s24, %s2953_s15  ;;  %p2958_p7 = scmp.lt.s32.totalorder %s2032_s24, %s4313_s8 }
 0xae5   : > { %p2959_p12 = scmp.lt.s32.totalorder %s2957_s13, %s2953_s15 }
 0xae6   : > { %p2955_p0 = pnand %p2954_p1, %p4314_p3 }
 0xae7   : > { %p2960_p4 = por %p2959_p12, %p2958_p7 }
 0xae8   : > { %p2956_p13 = pneg %p2955_p0 }
 0xaea   : > { %p2961_p6 = pnand %p2960_p4, %p2956_p13 }
 0xaec   : > { %2964 = shalt.err (!%p2961_p6)
}
 0xaed   : > { %2554 = dma.vmem_to_hbm [thread:$0]  (%p4314_p3), %s2035_s22, 128, %s2032_s24, %s2021_s30  }
 0xaee PF: > { %s4315_s27 = sld [smem:[#allocation44_spill]] }
 0xaef   : > { %s4316_s26 = sld [smem:[#allocation37_spill]] }
 0xaf0   : > { %s4317_s25 = sld [smem:[#allocation53_spill]] }
 0xaf4   : > { %p2583_p8 = scmp.ge.s32.totalorder %s4315_s27, 2 }
 0xaf5   : > { %s2046_s19 = sand.u32 1, %s4316_s26  }
 0xaf6   : > { %p4318_p10 = scmp.ne.s32.totalorder %s4317_s25, 0  ;;  %s2047_s14 = scalar_lea.sflag [#allocation7], %s2046_s19 }
 0xaf8   : > { %p2579_p2 = pnand %p2583_p8, %p4318_p10 }
 0xafa   : > { %p2580_p5 = pneg %p2579_p2 }
 0xafc   : > { %3068 = dma.done.wait (%p2580_p5), %s2047_s14, 128  }
 0xafd   : > { %3070 = vsyncadd (%p2580_p5), %s2047_s14, 4294967168  ;;  %s45_s16 = sadd.s32 1, %s4315_s27   ;;  %s4321_s21 = sld [smem:[#allocation29_spill]] }
 0xafe   : > { %p4021_p9 = scmp.ge.s32.totalorder %s45_s16, 10   ;;  %s4322_s1 = sld [smem:[#allocation30_spill]] }
 0xaff   : > { %s4323_s22 = sld [smem:[#allocation56_spill]] }
 0xb00   : > { %s4324_s2 = sld [smem:[#allocation31_spill]] }
 0xb01   : > { %s4325_s12 = sld [smem:[#allocation32_spill]] }
 0xb02   : > { %s4326_s23 = sld [smem:[#allocation49_spill]] }
 0xb03   : > { %s4327_s24 = sld [smem:[#allocation33_spill]] }
 0xb04   : > { %s4328_s25 = sld [smem:[#allocation34_spill]] }
 0xb05   : > { %s4329_s3 = sld [smem:[#allocation55_spill]] }
 0xb06   : > { %s4330_s26 = sld [smem:[#allocation35_spill]] }
 0xb07   : > { %s4331_s27 = sld [smem:[#allocation36_spill]] }
 0xb08   : > { %s4332_s7 = sld [smem:[#allocation47_spill]] }
 0xb09   : > { %s4333_s29 = sld [smem:[#allocation38_spill]] }
 0xb0a   : > { %s4334_s0 = sld [smem:[#allocation39_spill]] }
 0xb0b   : > { %s4335_s30 = sld [smem:[#allocation54_spill]]  ;;  %44 = sbr.rel (!%p4021_p9) target bundleno = 48 (0x30), region = 232 }
 0xb0c   : > { %s4336_s20 = sld [smem:[#allocation42_spill]] }
 0xb0d   : > { %s4337_s19 = sld [smem:[#allocation43_spill]] }
 0xb0e   : > { %s4338_s18 = sld [smem:[#allocation45_spill]]  ;;  %s4341_s28 = smov %s4332_s7 }
 0xb0f   : > { %s4339_s17 = sld [smem:[#allocation51_spill]] }
 0xb10   :  { %2052 = vsyncpa [#allocation6], 1 }
 0xb11   :  { %2054 = vsyncpa [#allocation6 + $0x1], 1 }
 0xb12   :  { %2055 = vsyncpa [#allocation9], 1 }
 0xb13   :  { %2057 = vsyncpa [#allocation9 + $0x1], 1 }
 0xb14   :  { %2058 = vsyncpa [#allocation12], 1 }
 0xb15   :  { %2060 = vsyncpa [#allocation12 + $0x1], 1 }
 0xb16   :  { %2061 = vsyncpa [#allocation7], 1 }
 0xb17   :  { %2063 = vsyncpa [#allocation7 + $0x1], 1 }

</bundles_post_ra>
